<compile_context>
chip_gen: v7x
topology: tpu7x:2x2x1
jax: 0.10.0
libtpu: 0.0.40
codegen_flags: <defaults>
</compile_context>

<pallas_src>
import jax
import jax.numpy as jnp
from jax.experimental import pallas as pl
from jax.experimental.pallas import tpu as pltpu

# ---- module hyper-parameters (globals in the original file) ----------------
N_LABELS = 10
EMB_DIM = 16
IMAGE_SIZE = 128   # required: two stride-4 k=6 p=1 convs then k=8 valid conv
NC = 3
NDF = 8
LEAKY_SLOPE = 0.2
BN_EPS = 1e-5


# ---------------------------- Pallas kernels --------------------------------
def _label_linear_kernel(emb_ref, w_ref, b_ref, o_ref):
    acc = jnp.dot(emb_ref[...], w_ref[...], preferred_element_type=jnp.float32)
    o_ref[...] = (acc + b_ref[...]).astype(o_ref.dtype)


def label_linear(emb_bf16, w_bf16, bias_f32, *, block_n=2048):
    """o = emb @ w + bias, tiled over the 16384-wide output (streams lin_w)."""
    B, K = emb_bf16.shape
    _, N = w_bf16.shape
    assert N % block_n == 0
    return pl.pallas_call(
        _label_linear_kernel,
        out_shape=jax.ShapeDtypeStruct((B, N), jnp.bfloat16),
        grid=(N // block_n,),
        in_specs=[
            pl.BlockSpec((B, K), lambda j: (0, 0)),
            pl.BlockSpec((K, block_n), lambda j: (0, j)),
            pl.BlockSpec((1, block_n), lambda j: (0, j)),
        ],
        out_specs=pl.BlockSpec((B, block_n), lambda j: (0, j)),
        compiler_params=pltpu.CompilerParams(dimension_semantics=("parallel",)),
    )(emb_bf16, w_bf16, bias_f32)


def _conv1_kernel(aimg_ref, alab_ref, wimg_ref, wlab_ref, o_ref):
    # Two accumulated matmuls (image channels + label channel) so the channel
    # concat of the conv1 input never materializes in HBM.
    acc = jnp.dot(aimg_ref[...], wimg_ref[...], preferred_element_type=jnp.float32)
    acc = acc + jnp.dot(alab_ref[...], wlab_ref[...], preferred_element_type=jnp.float32)
    acc = jnp.where(acc >= 0, acc, LEAKY_SLOPE * acc)
    o_ref[...] = acc.astype(o_ref.dtype)


def conv1_fused(a_img, a_lab, w_img, w_lab, *, block_m=512):
    """conv1 (im2col matmul) + LeakyReLU, tiled over M rows, bf16 out."""
    M, Kimg = a_img.shape
    _, Klab = a_lab.shape
    Cout = w_img.shape[1]
    assert M % block_m == 0  # M = B*1024 is always a multiple of 512
    return pl.pallas_call(
        _conv1_kernel,
        out_shape=jax.ShapeDtypeStruct((M, Cout), jnp.bfloat16),
        grid=(M // block_m,),
        in_specs=[
            pl.BlockSpec((block_m, Kimg), lambda i: (i, 0)),
            pl.BlockSpec((block_m, Klab), lambda i: (i, 0)),
            pl.BlockSpec((Kimg, Cout), lambda i: (0, 0)),
            pl.BlockSpec((Klab, Cout), lambda i: (0, 0)),
        ],
        out_specs=pl.BlockSpec((block_m, Cout), lambda i: (i, 0)),
        compiler_params=pltpu.CompilerParams(dimension_semantics=("parallel",)),
    )(a_img, a_lab, w_img, w_lab)


def _tail_kernel(a2_ref, w2_ref, g_ref, b_ref, w3_ref, sel_ref, o_ref):
    """Fused conv2 -> BatchNorm(batch stats) -> LeakyReLU -> conv3 -> Sigmoid."""
    # conv2 matmul: [M2, 288] x [288, 32] (bf16 operands, f32 accumulate)
    x = jnp.dot(a2_ref[...], w2_ref[...], preferred_element_type=jnp.float32)
    m = x.shape[0]
    inv_m = 1.0 / m
    # one-pass BN statistics: sum and sum-of-squares (biased variance, as in
    # nn.BatchNorm2d training-mode forward normalization)
    s1 = jnp.sum(x, axis=0, keepdims=True)
    s2 = jnp.sum(x * x, axis=0, keepdims=True)
    mean = s1 * inv_m
    var = jnp.maximum(s2 * inv_m - mean * mean, 0.0)
    y = (x - mean) * jax.lax.rsqrt(var + BN_EPS) * g_ref[...] + b_ref[...]
    y = jnp.where(y >= 0, y, LEAKY_SLOPE * y)
    # conv3 (8x8 valid conv == per-batch dot product): VPU multiply against the
    # spatially-tiled weight, tiny per-batch reduction, sigmoid epilogue.
    prod = y * w3_ref[...]                                            # [M2, 32]
    per_batch = jnp.dot(sel_ref[...], prod,
                        preferred_element_type=jnp.float32)           # [B, 32]
    logits = jnp.sum(per_batch, axis=1, keepdims=True)                # [B, 1]
    o_ref[...] = 1.0 / (1.0 + jnp.exp(-logits))


def tail_fused(a2, w2, gamma, beta, w3_full, sel):
    # NOTE: whole conv2 output (B*64 rows x 32 ch) is held in one VMEM block —
    # BN needs full-M statistics anyway; fine for small/medium batch.
    # TODO(synk): tile M2 with a two-pass (or Welford) BN for very large batch.
    M2, K2 = a2.shape
    C2 = w2.shape[1]
    B = sel.shape[0]
    return pl.pallas_call(
        _tail_kernel,
        out_shape=jax.ShapeDtypeStruct((B, 1), jnp.float32),
        grid=(1,),
        in_specs=[
            pl.BlockSpec((M2, K2), lambda i: (0, 0)),
            pl.BlockSpec((K2, C2), lambda i: (0, 0)),
            pl.BlockSpec((1, C2), lambda i: (0, 0)),
            pl.BlockSpec((1, C2), lambda i: (0, 0)),
            pl.BlockSpec((M2, C2), lambda i: (0, 0)),
            pl.BlockSpec((B, M2), lambda i: (0, 0)),
        ],
        out_specs=pl.BlockSpec((B, 1), lambda i: (0, 0)),
        compiler_params=pltpu.CompilerParams(dimension_semantics=("arbitrary",)),
    )(a2, w2, gamma, beta, w3_full, sel)


# ------------------------------ JAX glue -------------------------------------
def im2col_nhwc(x, kh, kw, stride, pad):
    """x: [B,H,W,C] -> patches [B, OH, OW, kh*kw*C] (feature ordering (i, j, c))."""
    if pad > 0:
        x = jnp.pad(x, ((0, 0), (pad, pad), (pad, pad), (0, 0)))
    B, H, W, C = x.shape
    OH = (H - kh) // stride + 1
    OW = (W - kw) // stride + 1
    cols = []
    for i in range(kh):
        for j in range(kw):
            cols.append(x[:, i:i + stride * OH:stride, j:j + stride * OW:stride, :])
    patches = jnp.stack(cols, axis=-2)                 # [B,OH,OW,kh*kw,C]
    return patches.reshape(B, OH, OW, kh * kw * C), OH, OW


def discriminator_forward(params, img_nchw, label):
    B = img_nchw.shape[0]

    # --- labels_disc: Embedding (gather = glue) + Linear (Pallas, bf16) ------
    emb = jnp.take(params["emb_table"], label, axis=0).astype(jnp.bfloat16)
    lab = label_linear(emb, params["lin_w"].astype(jnp.bfloat16), params["lin_b"])
    lab_plane = lab.reshape(B, IMAGE_SIZE, IMAGE_SIZE, 1)          # NHWC label plane

    # --- conv1 (+ fused LeakyReLU): split image/label channel columns --------
    img_nhwc = jnp.transpose(img_nchw, (0, 2, 3, 1)).astype(jnp.bfloat16)
    p_img, OH1, OW1 = im2col_nhwc(img_nhwc, 6, 6, 4, 1)            # [B,32,32,108]
    p_lab, _, _ = im2col_nhwc(lab_plane, 6, 6, 4, 1)               # [B,32,32,36]
    M1 = B * OH1 * OW1
    a_img = p_img.reshape(M1, 6 * 6 * NC)
    a_lab = p_lab.reshape(M1, 6 * 6 * 1)
    w1 = params["conv1_w"]                                         # [NDF, NC+1, 6, 6]
    w1_img = jnp.transpose(w1[:, :NC], (2, 3, 1, 0)).reshape(6 * 6 * NC, NDF)
    w1_lab = jnp.transpose(w1[:, NC:], (2, 3, 1, 0)).reshape(6 * 6 * 1, NDF)
    x1 = conv1_fused(a_img, a_lab,
                     w1_img.astype(jnp.bfloat16), w1_lab.astype(jnp.bfloat16))
    x1 = x1.reshape(B, OH1, OW1, NDF)                              # [B,32,32,8] bf16

    # --- fused tail: conv2 + BatchNorm + LeakyReLU + conv3 + Sigmoid ---------
    p2, OH2, OW2 = im2col_nhwc(x1, 6, 6, 4, 1)                     # [B,8,8,288]
    M2 = B * OH2 * OW2
    a2 = p2.reshape(M2, 6 * 6 * NDF)
    w2 = jnp.transpose(params["conv2_w"], (2, 3, 1, 0)).reshape(
        6 * 6 * NDF, 4 * NDF).astype(jnp.bfloat16)
    # conv3 weight laid out to match the (oh*OW+ow) row / channel column layout
    # of the conv2 output, tiled over batch; selection matrix does the per-batch
    # reduction without any in-kernel reshape.
    w3_mat = jnp.transpose(params["conv3_w"][0], (1, 2, 0)).reshape(OH2 * OW2, 4 * NDF)
    w3_full = jnp.tile(w3_mat, (B, 1)).astype(jnp.float32)         # [M2, 32]
    sel = jnp.repeat(jnp.eye(B, dtype=jnp.float32), OH2 * OW2, axis=1)  # [B, M2]

    out = tail_fused(a2, w2, params["bn_gamma"], params["bn_beta"], w3_full, sel)
    return out.reshape(B, 1, 1, 1)                                 # NCHW [B,1,1,1]


def init_params(key):
    ks = jax.random.split(key, 8)
    return {
        "emb_table": jax.random.normal(ks[0], (N_LABELS, EMB_DIM), jnp.float32),
        "lin_w": jax.random.normal(ks[1], (EMB_DIM, IMAGE_SIZE * IMAGE_SIZE),
                                   jnp.float32) * 0.02,
        "lin_b": jax.random.normal(ks[2], (1, IMAGE_SIZE * IMAGE_SIZE),
                                   jnp.float32) * 0.02,
        "conv1_w": jax.random.normal(ks[3], (NDF, NC + 1, 6, 6), jnp.float32) * 0.02,
        "conv2_w": jax.random.normal(ks[4], (NDF * 4, NDF, 6, 6), jnp.float32) * 0.02,
        "conv3_w": jax.random.normal(ks[5], (1, NDF * 4, 8, 8), jnp.float32) * 0.02,
        "bn_gamma": jnp.ones((1, NDF * 4), jnp.float32),
        "bn_beta": jnp.zeros((1, NDF * 4), jnp.float32),
    }


if __name__ == "__main__":
    key = jax.random.PRNGKey(0)
    k_img, k_lab, k_par = jax.random.split(key, 3)

    batch = 2
    img = jax.random.normal(k_img, (batch, NC, IMAGE_SIZE, IMAGE_SIZE), jnp.float32)
    label = jax.random.randint(k_lab, (batch,), 0, N_LABELS, jnp.int32)
    params = init_params(k_par)

    out = jax.jit(discriminator_forward)(params, img, label)
    out = jax.block_until_ready(out)

    assert out.shape == (batch, 1, 1, 1), out.shape
    assert bool(jnp.all((out >= 0.0) & (out <= 1.0)))
    print("KERNEL_OK")
</pallas_src>

<mosaic_0001>
module attributes {stable_mosaic.version = 11 : i64} {
  func.func @_label_linear_kernel(%arg0: i32, %arg1: memref<2x16xbf16, #tpu.memory_space<vmem>>, %arg2: memref<16x2048xbf16, #tpu.memory_space<vmem>>, %arg3: memref<1x2048xf32, #tpu.memory_space<vmem>>, %arg4: memref<2x2048xbf16, #tpu.memory_space<vmem>>) attributes {dimension_semantics = [#tpu.dimension_semantics<parallel>], iteration_bounds = array<i64: 8>, scalar_prefetch = 0 : i64, scratch_operands = 0 : i64, tpu.core_type = #tpu.core_type<tc>, window_params = [{pipeline_mode = #tpu.pipeline_mode<synchronous>, transform_indices = @transform_0, window_bounds = array<i64: 2, 16>}, {transform_indices = @transform_1, window_bounds = array<i64: 16, 2048>}, {transform_indices = @transform_2, window_bounds = array<i64: 1, 2048>}, {transform_indices = @transform_3, window_bounds = array<i64: 2, 2048>}]} {
    %c0 = arith.constant 0 : index
    %c0_0 = arith.constant 0 : index
    %0 = vector.load %arg1[%c0, %c0_0] : memref<2x16xbf16, #tpu.memory_space<vmem>>, vector<2x16xbf16>
    %c0_1 = arith.constant 0 : index
    %c0_2 = arith.constant 0 : index
    %1 = vector.load %arg2[%c0_1, %c0_2] : memref<16x2048xbf16, #tpu.memory_space<vmem>>, vector<16x2048xbf16>
    %cst = arith.constant dense<0.000000e+00> : vector<2x2048xf32>
    %2 = tpu.matmul %0, %1, %cst {dimension_numbers = #tpu.dot_dimension_numbers<[1], [0], [0], [1], [0, 0, 1, 1], [], []>} : vector<2x16xbf16>, vector<16x2048xbf16>, vector<2x2048xf32> -> vector<2x2048xf32>
    %c0_3 = arith.constant 0 : index
    %c0_4 = arith.constant 0 : index
    %3 = vector.load %arg3[%c0_3, %c0_4] : memref<1x2048xf32, #tpu.memory_space<vmem>>, vector<1x2048xf32>
    %4 = vector.broadcast %3 : vector<1x2048xf32> to vector<2x2048xf32>
    %5 = arith.addf %2, %4 : vector<2x2048xf32>
    %6 = arith.truncf %5 : vector<2x2048xf32> to vector<2x2048xbf16>
    %c0_5 = arith.constant 0 : index
    %c0_6 = arith.constant 0 : index
    %7 = vector.load %arg4[%c0_5, %c0_6] : memref<2x2048xbf16, #tpu.memory_space<vmem>>, vector<2x2048xbf16>
    tpu.vector_store %arg4[%c0_5, %c0_6], %6 {strides = array<i32>} : memref<2x2048xbf16, #tpu.memory_space<vmem>>, vector<2x2048xbf16>,
    return
  }
  func.func @transform_0(%arg0: i32) -> (i32, i32) {
    %c0_i32 = arith.constant 0 : i32
    %c0_i32_0 = arith.constant 0 : i32
    %c0_i32_1 = arith.constant 0 : i32
    return %c0_i32, %c0_i32_0 : i32, i32
  }
  func.func @transform_1(%arg0: i32) -> (i32, i32) {
    %c0_i32 = arith.constant 0 : i32
    %c0_i32_0 = arith.constant 0 : i32
    return %c0_i32, %arg0 : i32, i32
  }
  func.func @transform_2(%arg0: i32) -> (i32, i32) {
    %c0_i32 = arith.constant 0 : i32
    %c0_i32_0 = arith.constant 0 : i32
    return %c0_i32, %arg0 : i32, i32
  }
  func.func @transform_3(%arg0: i32) -> (i32, i32) {
    %c0_i32 = arith.constant 0 : i32
    %c0_i32_0 = arith.constant 0 : i32
    return %c0_i32, %arg0 : i32, i32
  }
}

module attributes {stable_mosaic.version = 11 : i64} {
  func.func @_conv1_kernel(%arg0: i32, %arg1: memref<512x108xbf16, #tpu.memory_space<vmem>>, %arg2: memref<512x36xbf16, #tpu.memory_space<vmem>>, %arg3: memref<108x8xbf16, #tpu.memory_space<vmem>>, %arg4: memref<36x8xbf16, #tpu.memory_space<vmem>>, %arg5: memref<512x8xbf16, #tpu.memory_space<vmem>>) attributes {dimension_semantics = [#tpu.dimension_semantics<parallel>], iteration_bounds = array<i64: 4>, scalar_prefetch = 0 : i64, scratch_operands = 0 : i64, tpu.core_type = #tpu.core_type<tc>, window_params = [{transform_indices = @transform_0, window_bounds = array<i64: 512, 108>}, {transform_indices = @transform_1, window_bounds = array<i64: 512, 36>}, {pipeline_mode = #tpu.pipeline_mode<synchronous>, transform_indices = @transform_2, window_bounds = array<i64: 108, 8>}, {pipeline_mode = #tpu.pipeline_mode<synchronous>, transform_indices = @transform_3, window_bounds = array<i64: 36, 8>}, {transform_indices = @transform_4, window_bounds = array<i64: 512, 8>}]} {
    %c0 = arith.constant 0 : index
    %c0_0 = arith.constant 0 : index
    %0 = vector.load %arg1[%c0, %c0_0] : memref<512x108xbf16, #tpu.memory_space<vmem>>, vector<512x108xbf16>
    %c0_1 = arith.constant 0 : index
    %c0_2 = arith.constant 0 : index
    %1 = vector.load %arg3[%c0_1, %c0_2] : memref<108x8xbf16, #tpu.memory_space<vmem>>, vector<108x8xbf16>
    %cst = arith.constant dense<0.000000e+00> : vector<512x8xf32>
    %2 = tpu.matmul %0, %1, %cst {dimension_numbers = #tpu.dot_dimension_numbers<[1], [0], [0], [1], [0, 0, 1, 1], [], []>} : vector<512x108xbf16>, vector<108x8xbf16>, vector<512x8xf32> -> vector<512x8xf32>
    %c0_3 = arith.constant 0 : index
    %c0_4 = arith.constant 0 : index
    %3 = vector.load %arg2[%c0_3, %c0_4] : memref<512x36xbf16, #tpu.memory_space<vmem>>, vector<512x36xbf16>
    %c0_5 = arith.constant 0 : index
    %c0_6 = arith.constant 0 : index
    %4 = vector.load %arg4[%c0_5, %c0_6] : memref<36x8xbf16, #tpu.memory_space<vmem>>, vector<36x8xbf16>
    %cst_7 = arith.constant dense<0.000000e+00> : vector<512x8xf32>
    %5 = tpu.matmul %3, %4, %cst_7 {dimension_numbers = #tpu.dot_dimension_numbers<[1], [0], [0], [1], [0, 0, 1, 1], [], []>} : vector<512x36xbf16>, vector<36x8xbf16>, vector<512x8xf32> -> vector<512x8xf32>
    %6 = arith.addf %2, %5 : vector<512x8xf32>
    %cst_8 = arith.constant 0.000000e+00 : f32
    %7 = vector.broadcast %cst_8 : f32 to vector<512x8xf32>
    %8 = arith.cmpf oge, %6, %7 : vector<512x8xf32>
    %cst_9 = arith.constant 2.000000e-01 : f32
    %9 = vector.broadcast %cst_9 : f32 to vector<512x8xf32>
    %10 = arith.mulf %9, %6 : vector<512x8xf32>
    %11 = arith.select %8, %6, %10 : vector<512x8xi1>, vector<512x8xf32>
    %12 = arith.truncf %11 : vector<512x8xf32> to vector<512x8xbf16>
    %c0_10 = arith.constant 0 : index
    %c0_11 = arith.constant 0 : index
    %13 = vector.load %arg5[%c0_10, %c0_11] : memref<512x8xbf16, #tpu.memory_space<vmem>>, vector<512x8xbf16>
    tpu.vector_store %arg5[%c0_10, %c0_11], %12 {strides = array<i32>} : memref<512x8xbf16, #tpu.memory_space<vmem>>, vector<512x8xbf16>,
    return
  }
  func.func @transform_0(%arg0: i32) -> (i32, i32) {
    %c0_i32 = arith.constant 0 : i32
    %c0_i32_0 = arith.constant 0 : i32
    return %arg0, %c0_i32 : i32, i32
  }
  func.func @transform_1(%arg0: i32) -> (i32, i32) {
    %c0_i32 = arith.constant 0 : i32
    %c0_i32_0 = arith.constant 0 : i32
    return %arg0, %c0_i32 : i32, i32
  }
  func.func @transform_2(%arg0: i32) -> (i32, i32) {
    %c0_i32 = arith.constant 0 : i32
    %c0_i32_0 = arith.constant 0 : i32
    %c0_i32_1 = arith.constant 0 : i32
    return %c0_i32, %c0_i32_0 : i32, i32
  }
  func.func @transform_3(%arg0: i32) -> (i32, i32) {
    %c0_i32 = arith.constant 0 : i32
    %c0_i32_0 = arith.constant 0 : i32
    %c0_i32_1 = arith.constant 0 : i32
    return %c0_i32, %c0_i32_0 : i32, i32
  }
  func.func @transform_4(%arg0: i32) -> (i32, i32) {
    %c0_i32 = arith.constant 0 : i32
    %c0_i32_0 = arith.constant 0 : i32
    return %arg0, %c0_i32 : i32, i32
  }
}

module attributes {stable_mosaic.version = 11 : i64} {
  func.func @_tail_kernel(%arg0: i32, %arg1: memref<128x288xbf16, #tpu.memory_space<vmem>>, %arg2: memref<288x32xbf16, #tpu.memory_space<vmem>>, %arg3: memref<1x32xf32, #tpu.memory_space<vmem>>, %arg4: memref<1x32xf32, #tpu.memory_space<vmem>>, %arg5: memref<128x32xf32, #tpu.memory_space<vmem>>, %arg6: memref<2x128xf32, #tpu.memory_space<vmem>>, %arg7: memref<2x1xf32, #tpu.memory_space<vmem>>) attributes {dimension_semantics = [#tpu.dimension_semantics<arbitrary>], iteration_bounds = array<i64: 1>, scalar_prefetch = 0 : i64, scratch_operands = 0 : i64, tpu.core_type = #tpu.core_type<tc>, window_params = [{pipeline_mode = #tpu.pipeline_mode<synchronous>, transform_indices = @transform_0, window_bounds = array<i64: 128, 288>}, {pipeline_mode = #tpu.pipeline_mode<synchronous>, transform_indices = @transform_1, window_bounds = array<i64: 288, 32>}, {pipeline_mode = #tpu.pipeline_mode<synchronous>, transform_indices = @transform_2, window_bounds = array<i64: 1, 32>}, {pipeline_mode = #tpu.pipeline_mode<synchronous>, transform_indices = @transform_3, window_bounds = array<i64: 1, 32>}, {pipeline_mode = #tpu.pipeline_mode<synchronous>, transform_indices = @transform_4, window_bounds = array<i64: 128, 32>}, {pipeline_mode = #tpu.pipeline_mode<synchronous>, transform_indices = @transform_5, window_bounds = array<i64: 2, 128>}, {pipeline_mode = #tpu.pipeline_mode<synchronous>, transform_indices = @transform_6, window_bounds = array<i64: 2, 1>}]} {
    %c0 = arith.constant 0 : index
    %c0_0 = arith.constant 0 : index
    %0 = vector.load %arg1[%c0, %c0_0] : memref<128x288xbf16, #tpu.memory_space<vmem>>, vector<128x288xbf16>
    %c0_1 = arith.constant 0 : index
    %c0_2 = arith.constant 0 : index
    %1 = vector.load %arg2[%c0_1, %c0_2] : memref<288x32xbf16, #tpu.memory_space<vmem>>, vector<288x32xbf16>
    %cst = arith.constant dense<0.000000e+00> : vector<128x32xf32>
    %2 = tpu.matmul %0, %1, %cst {dimension_numbers = #tpu.dot_dimension_numbers<[1], [0], [0], [1], [0, 0, 1, 1], [], []>} : vector<128x288xbf16>, vector<288x32xbf16>, vector<128x32xf32> -> vector<128x32xf32>
    %cst_3 = arith.constant dense<0.000000e+00> : vector<32xf32>
    %3 = vector.multi_reduction <add>, %2, %cst_3 [0] : vector<128x32xf32> to vector<32xf32>
    %4 = vector.shape_cast %3 : vector<32xf32> to vector<1x32xf32>
    %5 = arith.mulf %2, %2 : vector<128x32xf32>
    %cst_4 = arith.constant dense<0.000000e+00> : vector<32xf32>
    %6 = vector.multi_reduction <add>, %5, %cst_4 [0] : vector<128x32xf32> to vector<32xf32>
    %7 = vector.shape_cast %6 : vector<32xf32> to vector<1x32xf32>
    %cst_5 = arith.constant 7.812500e-03 : f32
    %8 = vector.broadcast %cst_5 : f32 to vector<1x32xf32>
    %9 = arith.mulf %4, %8 : vector<1x32xf32>
    %cst_6 = arith.constant 7.812500e-03 : f32
    %10 = vector.broadcast %cst_6 : f32 to vector<1x32xf32>
    %11 = arith.mulf %7, %10 : vector<1x32xf32>
    %12 = arith.mulf %9, %9 : vector<1x32xf32>
    %13 = arith.subf %11, %12 : vector<1x32xf32>
    %cst_7 = arith.constant 0.000000e+00 : f32
    %14 = vector.broadcast %cst_7 : f32 to vector<1x32xf32>
    %15 = arith.maximumf %13, %14 : vector<1x32xf32>
    %16 = vector.broadcast %9 : vector<1x32xf32> to vector<128x32xf32>
    %17 = arith.subf %2, %16 : vector<128x32xf32>
    %cst_8 = arith.constant 9.99999974E-6 : f32
    %18 = vector.broadcast %cst_8 : f32 to vector<1x32xf32>
    %19 = arith.addf %15, %18 : vector<1x32xf32>
    %20 = math.rsqrt %19 : vector<1x32xf32>
    %21 = vector.broadcast %20 : vector<1x32xf32> to vector<128x32xf32>
    %22 = arith.mulf %17, %21 : vector<128x32xf32>
    %c0_9 = arith.constant 0 : index
    %c0_10 = arith.constant 0 : index
    %23 = vector.load %arg3[%c0_9, %c0_10] : memref<1x32xf32, #tpu.memory_space<vmem>>, vector<1x32xf32>
    %24 = vector.broadcast %23 : vector<1x32xf32> to vector<128x32xf32>
    %25 = arith.mulf %22, %24 : vector<128x32xf32>
    %c0_11 = arith.constant 0 : index
    %c0_12 = arith.constant 0 : index
    %26 = vector.load %arg4[%c0_11, %c0_12] : memref<1x32xf32, #tpu.memory_space<vmem>>, vector<1x32xf32>
    %27 = vector.broadcast %26 : vector<1x32xf32> to vector<128x32xf32>
    %28 = arith.addf %25, %27 : vector<128x32xf32>
    %cst_13 = arith.constant 0.000000e+00 : f32
    %29 = vector.broadcast %cst_13 : f32 to vector<128x32xf32>
    %30 = arith.cmpf oge, %28, %29 : vector<128x32xf32>
    %cst_14 = arith.constant 2.000000e-01 : f32
    %31 = vector.broadcast %cst_14 : f32 to vector<128x32xf32>
    %32 = arith.mulf %31, %28 : vector<128x32xf32>
    %33 = arith.select %30, %28, %32 : vector<128x32xi1>, vector<128x32xf32>
    %c0_15 = arith.constant 0 : index
    %c0_16 = arith.constant 0 : index
    %34 = vector.load %arg5[%c0_15, %c0_16] : memref<128x32xf32, #tpu.memory_space<vmem>>, vector<128x32xf32>
    %35 = arith.mulf %33, %34 : vector<128x32xf32>
    %c0_17 = arith.constant 0 : index
    %c0_18 = arith.constant 0 : index
    %36 = vector.load %arg6[%c0_17, %c0_18] : memref<2x128xf32, #tpu.memory_space<vmem>>, vector<2x128xf32>
    %cst_19 = arith.constant dense<0.000000e+00> : vector<2x32xf32>
    %37 = tpu.matmul %36, %35, %cst_19 {dimension_numbers = #tpu.dot_dimension_numbers<[1], [0], [0], [1], [0, 0, 1, 1], [], []>} : vector<2x128xf32>, vector<128x32xf32>, vector<2x32xf32> -> vector<2x32xf32>
    %cst_20 = arith.constant dense<0.000000e+00> : vector<2xf32>
    %38 = vector.multi_reduction <add>, %37, %cst_20 [1] : vector<2x32xf32> to vector<2xf32>
    %39 = vector.shape_cast %38 : vector<2xf32> to vector<2x1xf32>
    %cst_21 = arith.constant 0.000000e+00 : f32
    %40 = vector.broadcast %cst_21 : f32 to vector<2x1xf32>
    %41 = arith.subf %40, %39 : vector<2x1xf32>
    %42 = math.exp %41 : vector<2x1xf32>
    %cst_22 = arith.constant 1.000000e+00 : f32
    %43 = vector.broadcast %cst_22 : f32 to vector<2x1xf32>
    %44 = arith.addf %43, %42 : vector<2x1xf32>
    %cst_23 = arith.constant 1.000000e+00 : f32
    %45 = vector.broadcast %cst_23 : f32 to vector<2x1xf32>
    %46 = arith.divf %45, %44 : vector<2x1xf32>
    %c0_24 = arith.constant 0 : index
    %c0_25 = arith.constant 0 : index
    %47 = vector.load %arg7[%c0_24, %c0_25] : memref<2x1xf32, #tpu.memory_space<vmem>>, vector<2x1xf32>
    tpu.vector_store %arg7[%c0_24, %c0_25], %46 {strides = array<i32>} : memref<2x1xf32, #tpu.memory_space<vmem>>, vector<2x1xf32>,
    return
  }
  func.func @transform_0(%arg0: i32) -> (i32, i32) {
    %c0_i32 = arith.constant 0 : i32
    %c0_i32_0 = arith.constant 0 : i32
    %c0_i32_1 = arith.constant 0 : i32
    return %c0_i32, %c0_i32_0 : i32, i32
  }
  func.func @transform_1(%arg0: i32) -> (i32, i32) {
    %c0_i32 = arith.constant 0 : i32
    %c0_i32_0 = arith.constant 0 : i32
    %c0_i32_1 = arith.constant 0 : i32
    return %c0_i32, %c0_i32_0 : i32, i32
  }
  func.func @transform_2(%arg0: i32) -> (i32, i32) {
    %c0_i32 = arith.constant 0 : i32
    %c0_i32_0 = arith.constant 0 : i32
    %c0_i32_1 = arith.constant 0 : i32
    return %c0_i32, %c0_i32_0 : i32, i32
  }
  func.func @transform_3(%arg0: i32) -> (i32, i32) {
    %c0_i32 = arith.constant 0 : i32
    %c0_i32_0 = arith.constant 0 : i32
    %c0_i32_1 = arith.constant 0 : i32
    return %c0_i32, %c0_i32_0 : i32, i32
  }
  func.func @transform_4(%arg0: i32) -> (i32, i32) {
    %c0_i32 = arith.constant 0 : i32
    %c0_i32_0 = arith.constant 0 : i32
    %c0_i32_1 = arith.constant 0 : i32
    return %c0_i32, %c0_i32_0 : i32, i32
  }
  func.func @transform_5(%arg0: i32) -> (i32, i32) {
    %c0_i32 = arith.constant 0 : i32
    %c0_i32_0 = arith.constant 0 : i32
    %c0_i32_1 = arith.constant 0 : i32
    return %c0_i32, %c0_i32_0 : i32, i32
  }
  func.func @transform_6(%arg0: i32) -> (i32, i32) {
    %c0_i32 = arith.constant 0 : i32
    %c0_i32_0 = arith.constant 0 : i32
    %c0_i32_1 = arith.constant 0 : i32
    return %c0_i32, %c0_i32_0 : i32, i32
  }
}

</mosaic_0001>

<bundles_post_ra>
// kernel: discriminator_forward.3
= control target key start
LH: loop header
LB: loop body
LE: loop exit
PB: predicated region body
PF: predicated region fallthrough
CT: control target
= control target key end

     0   :  { %s1071_s12 = smov 0   ;;  %s1073_s13 = smov 0   ;;  %s1218_s0 = inlined_call_operand.vmem [shape: bf16[2,16], index: 0, kind: input, shape index: {}]   ;;  %s1219_s1 = inlined_call_operand.vmem [shape: bf16[16,16384], index: 1, kind: input, shape index: {}]   ;;  %s1220_s2 = inlined_call_operand.vmem [shape: f32[1,16384], index: 2, kind: input, shape index: {}]   ;;  %s1221_s3 = inlined_call_operand.vmem [shape: bf16[2,16384], index: 3, kind: output, shape index: {}]  }
   0x1   :  { %s1075_s14 = smov 0  }
   0x2 LB: > { %s953_s15 = sadd.s32 4294967295, %s1047_s14   ;;  %s1088_s16 = sadd.s32 1, %s1047_s14   ;;  %s1047_s14 = sphi %s1075_s14, %s1224_s14   ;;  %s1043_s13 = sphi %s1073_s13, %s1223_s13   ;;  %s1039_s12 = sphi %s1071_s12, %s1222_s12  }
   0x3   : > { %s38_s17 = ssub.s32 %s1047_s14, %s1088_s16  ;;  %s41_s18 = sadd.s32 1, %s1043_s13 }
   0x4   : > { %p39_p0 = scmp.eq.s32.totalorder %s38_s17, 0  ;;  %p48_p1 = scmp.ne.s32.totalorder %s1043_s13, %s1039_s12 }
   0x5   : > { %p49_p2 = scmp.eq.s32.totalorder %s1047_s14, 0  ;;  %p956_p4 = scmp.ge.s32.totalorder %s1047_s14, 8 }
   0x6   : > { %s1097_s19 = scalar_select %p39_p0, %s1043_s13, %s41_s18  }
   0x7   : > { %p50_p3 = por %p49_p2, %p48_p1  ;;  %129 = sbr.rel (%p956_p4) target bundleno = 26 (0x1a), region = 20 }
   0xe   : > { %132 = sbr.rel (!%p50_p3) target bundleno = 26 (0x1a), region = 24  ;;  %s134_s20 = sand.u32 (%p50_p3), 1, %s1043_s13  }
   0xf   : > { %s998_s21 = sshll.u32 (%p50_p3), %s1047_s14, 6  ;;  %s957_s22 = sshll.u32 (%p50_p3), %s134_s20, 7 }
  0x10   : > { %s1105_s25 = scalar_lea.vmem (%p50_p3), %s1219_s1, %s998_s21  ;;  %s136_s26 = scalar_lea.vmem (%p50_p3), [#allocation2], %s957_s22 }
  0x11   : > { %v152_v0 = vld [vmem:[%s1105_s25] sm:$0xff] (%p50_p3)  ;;  %v154_v1 = vld [vmem:[%s1105_s25 + $0x8] sm:$0xff] (%p50_p3)  ;;  %v156_v2 = vld [vmem:[%s1105_s25 + $0x10] sm:$0xff] (%p50_p3) }
  0x12   : > { %153 = vst [vmem:[%s136_s26] sm:$0xff] (%p50_p3), %v152_v0  ;;  %155 = vst [vmem:[%s136_s26 + $0x8] sm:$0xff] (%p50_p3), %v154_v1  ;;  %v158_v3 = vld [vmem:[%s1105_s25 + $0x18] sm:$0xff] (%p50_p3)  ;;  %v160_v4 = vld [vmem:[%s1105_s25 + $0x20] sm:$0xff] (%p50_p3) }
  0x13   : > { %157 = vst [vmem:[%s136_s26 + $0x10] sm:$0xff] (%p50_p3), %v156_v2  ;;  %v162_v5 = vld [vmem:[%s1105_s25 + $0x28] sm:$0xff] (%p50_p3)  ;;  %159 = vst [vmem:[%s136_s26 + $0x18] sm:$0xff] (%p50_p3), %v158_v3  ;;  %v164_v6 = vld [vmem:[%s1105_s25 + $0x30] sm:$0xff] (%p50_p3) }
  0x14   : > { %161 = vst [vmem:[%s136_s26 + $0x20] sm:$0xff] (%p50_p3), %v160_v4  ;;  %163 = vst [vmem:[%s136_s26 + $0x28] sm:$0xff] (%p50_p3), %v162_v5  ;;  %v166_v7 = vld [vmem:[%s1105_s25 + $0x38] sm:$0xff] (%p50_p3)  ;;  %v168_v8 = vld [vmem:[%s1105_s25 + $0x200] sm:$0xff] (%p50_p3) }
  0x15   : > { %165 = vst [vmem:[%s136_s26 + $0x30] sm:$0xff] %v164_v6  ;;  %167 = vst [vmem:[%s136_s26 + $0x38] sm:$0xff] %v166_v7  ;;  %v170_v9 = vld [vmem:[%s1105_s25 + $0x208] sm:$0xff]  ;;  %v172_v10 = vld [vmem:[%s1105_s25 + $0x210] sm:$0xff] }
  0x16   : > { %169 = vst [vmem:[%s136_s26 + $0x40] sm:$0xff] %v168_v8  ;;  %v174_v11 = vld [vmem:[%s1105_s25 + $0x218] sm:$0xff]  ;;  %171 = vst [vmem:[%s136_s26 + $0x48] sm:$0xff] %v170_v9  ;;  %v176_v12 = vld [vmem:[%s1105_s25 + $0x220] sm:$0xff] }
  0x17   : > { %173 = vst [vmem:[%s136_s26 + $0x50] sm:$0xff] %v172_v10  ;;  %175 = vst [vmem:[%s136_s26 + $0x58] sm:$0xff] %v174_v11  ;;  %v178_v13 = vld [vmem:[%s1105_s25 + $0x228] sm:$0xff]  ;;  %v180_v14 = vld [vmem:[%s1105_s25 + $0x230] sm:$0xff] }
  0x18   : > { %177 = vst [vmem:[%s136_s26 + $0x60] sm:$0xff] %v176_v12  ;;  %179 = vst [vmem:[%s136_s26 + $0x68] sm:$0xff] %v178_v13  ;;  %v182_v15 = vld [vmem:[%s1105_s25 + $0x238] sm:$0xff] }
  0x19   : > { %181 = vst [vmem:[%s136_s26 + $0x70] sm:$0xff] %v180_v14  ;;  %183 = vst [vmem:[%s136_s26 + $0x78] sm:$0xff] %v182_v15 }
  0x1a PF: > { %p960_p5 = scmp.ge.s32.totalorder %s1047_s14, 1  ;;  %p196_p6 = scmp.lt.s32.totalorder %s1047_s14, 9 }
  0x1c   : > { %p197_p7 = pnand %p960_p5, %p196_p6 }
  0x1d   : > { %s203_s27 = sand.u32 (!%p197_p7), 1, %s1039_s12   ;;  %v1049_v16 = vmov (!%p197_p7), 0   ;;  %v241_v33 = vld [vmem:[%s1218_s0] sm:$0x1] (!%p197_p7)  ;;  %vm422_vm0 = vcmask (!%p197_p7), 130048   ;;  %s962_s5 = sshll.u32 (!%p197_p7), %s953_s15, 4  ;;  %v262_v50 = vlaneseq (!%p197_p7) }
  0x1e   : > { %200 = sbr.rel (%p197_p7) target bundleno = 290 (0x122), region = 51  ;;  %s961_s28 = sshll.u32 (!%p197_p7), %s203_s27, 7  ;;  %458 = vmatprep.mubr.bf16.mxu0 (!%p197_p7), %v1049_v16  ;;  %499 = vmatprep.mubr.bf16.mxu1 (!%p197_p7), %v1049_v16  ;;  %v1050_v53 = vmov (!%p197_p7), 1966171168  }
  0x1f   : > { %s1128_s29 = scalar_lea.vmem (!%p197_p7), [#allocation2], %s961_s28  ;;  %p231_p8 = scmp.lt.s32.totalorder (!%p197_p7), %s962_s5, 127  ;;  %v1167_v51 = vshrl.u32 (!%p197_p7), %v262_v50, 7  ;;  %v791_v54 = vunpack.c.l.s4 (!%p197_p7), %v1050_v53 }
  0x20   : > { %v242_v17 = vld [vmem:[%s1128_s29] sm:$0xff] (!%p197_p7)  ;;  %v243_v19 = vld [vmem:[%s1128_s29 + $0x8] sm:$0xff] (!%p197_p7)  ;;  %v244_v23 = vld [vmem:[%s1128_s29 + $0x10] sm:$0xff] (!%p197_p7) }
  0x21   : > { %v250_v18 = vld [vmem:[%s1128_s29 + $0x40] sm:$0xff] (!%p197_p7)  ;;  %v251_v21 = vld [vmem:[%s1128_s29 + $0x48] sm:$0xff] (!%p197_p7)  ;;  %v252_v24 = vld [vmem:[%s1128_s29 + $0x50] sm:$0xff] (!%p197_p7)  ;;  %v264_v52 = vsub.s32 (!%p197_p7), 0, %v1167_v51  ;;  %v272_v56 = vsub.s32 (!%p197_p7), 2, %v1167_v51  ;;  %v268_v57 = vsub.s32 (!%p197_p7), 1, %v1167_v51  ;;  %v792_v60 = vunpack.c.0.s8 (!%p197_p7), %v791_v54 }
  0x22   : > { %v965_v20 = vcombine.high (!%p197_p7), %v242_v17, %v250_v18  ;;  %v964_v22 = vcombine.low (!%p197_p7), %v242_v17, %v250_v18  ;;  %v967_v25 = vcombine.high (!%p197_p7), %v243_v19, %v251_v21  ;;  %v966_v26 = vcombine.low (!%p197_p7), %v243_v19, %v251_v21  ;;  %v245_v28 = vld [vmem:[%s1128_s29 + $0x18] sm:$0xff] (!%p197_p7)  ;;  %v246_v31 = vld [vmem:[%s1128_s29 + $0x20] sm:$0xff] (!%p197_p7)  ;;  %v247_v35 = vld [vmem:[%s1128_s29 + $0x28] sm:$0xff] (!%p197_p7) }
  0x23   : > { %v969_v27 = vcombine.high (!%p197_p7), %v244_v23, %v252_v24  ;;  %v253_v29 = vld [vmem:[%s1128_s29 + $0x58] sm:$0xff] (!%p197_p7)  ;;  %v254_v32 = vld [vmem:[%s1128_s29 + $0x60] sm:$0xff] (!%p197_p7)  ;;  %v968_v34 = vcombine.low (!%p197_p7), %v244_v23, %v252_v24  ;;  %v255_v36 = vld [vmem:[%s1128_s29 + $0x68] sm:$0xff] (!%p197_p7)  ;;  %v276_v58 = vsub.s32 (!%p197_p7), 3, %v1167_v51  ;;  %v1181_v4 = vsub.s32 (!%p197_p7), %v792_v60, %v1167_v51 }
  0x24   : > { %426 = vmatprep.subr.bf16.mxu0 (!%p197_p7), %v965_v20  ;;  %v971_v30 = vcombine.high (!%p197_p7), %v245_v28, %v253_v29  ;;  %467 = vmatprep.subr.bf16.mxu1 (!%p197_p7), %v967_v25  ;;  %v970_v37 = vcombine.low (!%p197_p7), %v245_v28, %v253_v29  ;;  %v973_v38 = vcombine.high (!%p197_p7), %v246_v31, %v254_v32  ;;  %v248_v40 = vld [vmem:[%s1128_s29 + $0x30] sm:$0xff] (!%p197_p7)  ;;  %v249_v43 = vld [vmem:[%s1128_s29 + $0x38] sm:$0xff] (!%p197_p7)  ;;  %v280_v5 = vsub.s32 (!%p197_p7), 4, %v1167_v51 }
  0x25   : > { %427 = vmatpush1.bf16.msra.mxu0 %v964_v22  ;;  %468 = vmatpush1.bf16.msra.mxu1 %v966_v26  ;;  %v975_v39 = vcombine.high %v247_v35, %v255_v36  ;;  %v256_v41 = vld [vmem:[%s1128_s29 + $0x70] sm:$0xff]  ;;  %v972_v42 = vcombine.low %v246_v31, %v254_v32  ;;  %v257_v44 = vld [vmem:[%s1128_s29 + $0x78] sm:$0xff]  ;;  %v974_v45 = vcombine.low %v247_v35, %v255_v36  ;;  %s1226_s5 = smov (!%p231_p8, %s962_s5), 127  ;;  %v288_v10 = vsub.s32 6, %v1167_v51 }
  0x26   : > { %508 = vmatprep.subr.bf16.mxu0 %v969_v27  ;;  %549 = vmatprep.subr.bf16.mxu1 %v971_v30  ;;  %v977_v46 = vcombine.high %v248_v40, %v256_v41  ;;  %v979_v47 = vcombine.high %v249_v43, %v257_v44  ;;  %v976_v48 = vcombine.low %v248_v40, %v256_v41  ;;  %s1173_s8 = scalar_lea.vmem %s1220_s2, %s1226_s5  ;;  %v284_v11 = vsub.s32 5, %v1167_v51  ;;  %s1198_s11 = scalar_lea.vmem %s1221_s3, %s1226_s5 }
  0x27   : > { %v978_v49 = vcombine.low %v249_v43, %v257_v44  ;;  %v258_v55 = vld [vmem:[%s1173_s8] sm:$0xff]  ;;  %v292_v15 = vsub.s32 7, %v1167_v51 }
  0x28   : > { %980 = vmatmul.mubr.msk.bf16.vlgmr.msra.gmra.mrb[0].mxu0 %vm422_vm0, %v241_v33  ;;  %981 = vmatmul.mubr.msk.bf16.vlgmr.msra.gmra.mrb[0].mxu1 %vm422_vm0, %v241_v33  ;;  %v265_v59 = vrot.slane %v258_v55, %v264_v52  ;;  %v273_v61 = vrot.slane %v258_v55, %v272_v56  ;;  %v269_v62 = vrot.slane %v258_v55, %v268_v57 }
  0x29   : > { %509 = vmatpush1.bf16.msra.mxu0 %v968_v34  ;;  %550 = vmatpush1.bf16.msra.mxu1 %v970_v37  ;;  %v277_v63 = vrot.slane %v258_v55, %v276_v58  ;;  %v281_v19 = vrot.slane %v258_v55, %v280_v5  ;;  %v289_v21 = vrot.slane %v258_v55, %v288_v10  ;;  %v259_v34 = vld [vmem:[%s1173_s8 + $0x8] sm:$0xff] }
  0x2a   : > { %540 = vmatprep.mubr.bf16.mxu0 %v1049_v16  ;;  %581 = vmatprep.mubr.bf16.mxu1 %v1049_v16  ;;  %v285_v22 = vrot.slane %v258_v55, %v284_v11  ;;  %v293_v24 = vrot.slane %v258_v55, %v292_v15  ;;  %v297_v41 = vrot.slane %v259_v34, %v264_v52 }
  0x2b   : > { %590 = vmatprep.subr.bf16.mxu0 %v973_v38  ;;  %631 = vmatprep.subr.bf16.mxu1 %v975_v39  ;;  %v305_v43 = vrot.slane %v259_v34, %v272_v56  ;;  %v301_v44 = vrot.slane %v259_v34, %v268_v57 }
  0x30   : > { %982 = vmatmul.mubr.msk.bf16.vlgmr.msra.gmra.mrb[4].mxu0 %vm422_vm0, %v241_v33  ;;  %983 = vmatmul.mubr.msk.bf16.vlgmr.msra.gmra.mrb[4].mxu1 %vm422_vm0, %v241_v33 }
  0x31   : > { %591 = vmatpush1.bf16.msra.mxu0 %v972_v42  ;;  %632 = vmatpush1.bf16.msra.mxu1 %v974_v45 }
  0x32   : > { %622 = vmatprep.mubr.bf16.mxu0 %v1049_v16  ;;  %663 = vmatprep.mubr.bf16.mxu1 %v1049_v16 }
  0x33   : > { %672 = vmatprep.subr.bf16.mxu0 %v977_v46  ;;  %713 = vmatprep.subr.bf16.mxu1 %v979_v47  ;;  %v309_v46 = vrot.slane %v259_v34, %v276_v58 }
  0x38   : > { %984 = vmatmul.mubr.msk.bf16.vlgmr.msra.gmra.mrb[8].mxu0 %vm422_vm0, %v241_v33  ;;  %985 = vmatmul.mubr.msk.bf16.vlgmr.msra.gmra.mrb[8].mxu1 %vm422_vm0, %v241_v33 }
  0x39   : > { %673 = vmatpush1.bf16.msra.mxu0 %v976_v48  ;;  %714 = vmatpush1.bf16.msra.mxu1 %v978_v49 }
  0x3a   : > { %704 = vmatprep.mubr.bf16.mxu0 %v1049_v16  ;;  %745 = vmatprep.mubr.bf16.mxu1 %v1049_v16 }
  0x40   : > { %986 = vmatmul.mubr.msk.bf16.vlgmr.msra.gmra.mrb[12].mxu0 %vm422_vm0, %v241_v33  ;;  %987 = vmatmul.mubr.msk.bf16.vlgmr.msra.gmra.mrb[12].mxu1 %vm422_vm0, %v241_v33 }
  0xfb   : > { %v460_v0 = vpop.f32.mrb[0].mxu0  ;;  %v501_v2 = vpop.f32.mrb[0].mxu1 }
  0xfc   : > { %v461_v1 = vadd.f32 %v460_v0, %v265_v59  ;;  %v462_v3 = vpop.f32.mrb[1].mxu0  ;;  %v502_v6 = vadd.f32 %v501_v2, %v273_v61  ;;  %v503_v8 = vpop.f32.mrb[1].mxu1 }
  0xfd   : > { %v463_v7 = vadd.f32 %v462_v3, %v269_v62  ;;  %v464_v9 = vpop.f32.mrb[2].mxu0  ;;  %v504_v12 = vadd.f32 %v503_v8, %v277_v63  ;;  %v505_v13 = vpop.f32.mrb[2].mxu1  ;;  %v321_v3 = vrot.slane %v259_v34, %v288_v10  ;;  %v325_v8 = vrot.slane %v259_v34, %v292_v15 }
  0xfe   : > { %v465_v14 = vpop.f32.mrb[3].mxu0  ;;  %v506_v17 = vpop.f32.mrb[3].mxu1 }
  0xff   : > { %v988_v16 = vpack.c.bf16 %v463_v7, %v461_v1  ;;  %v989_v18 = vpack.c.bf16 %v504_v12, %v502_v6  ;;  %v313_v1 = vrot.slane %v259_v34, %v280_v5  ;;  %v317_v6 = vrot.slane %v259_v34, %v284_v11 }
 0x101   : > { %v796_v20 = vrot.slane %v988_v16, %v1181_v4  ;;  %v803_v23 = vrot.slane %v989_v18, %v1181_v4 }
 0x103   : > { %v542_v25 = vpop.f32.mrb[4].mxu0  ;;  %v818_v26 = vcombine.low %v796_v20, %v803_v23  ;;  %v583_v28 = vpop.f32.mrb[4].mxu1 }
 0x104   : > { %v543_v27 = vadd.f32 %v542_v25, %v281_v19  ;;  %v544_v29 = vpop.f32.mrb[5].mxu0  ;;  %v584_v30 = vadd.f32 %v583_v28, %v289_v21  ;;  %v585_v32 = vpop.f32.mrb[5].mxu1 }
 0x105   : > { %v545_v31 = vadd.f32 %v544_v29, %v285_v22  ;;  %v546_v33 = vpop.f32.mrb[6].mxu0  ;;  %v586_v35 = vadd.f32 %v585_v32, %v293_v24  ;;  %v587_v36 = vpop.f32.mrb[6].mxu1  ;;  %v826_v60 = vrot.slane %v818_v26, %v1181_v4 }
 0x106   : > { %v547_v37 = vpop.f32.mrb[7].mxu0  ;;  %v588_v39 = vpop.f32.mrb[7].mxu1 }
 0x107   : > { %v990_v38 = vpack.c.bf16 %v545_v31, %v543_v27  ;;  %v991_v40 = vpack.c.bf16 %v586_v35, %v584_v30 }
 0x109   : > { %v810_v42 = vrot.slane %v990_v38, %v1181_v4  ;;  %v817_v45 = vrot.slane %v991_v40, %v1181_v4 }
 0x10b   : > { %v624_v47 = vpop.f32.mrb[8].mxu0  ;;  %v819_v48 = vcombine.low %v810_v42, %v817_v45  ;;  %v665_v50 = vpop.f32.mrb[8].mxu1 }
 0x10c   : > { %v625_v49 = vadd.f32 %v624_v47, %v297_v41  ;;  %v626_v51 = vpop.f32.mrb[9].mxu0  ;;  %v666_v53 = vadd.f32 %v665_v50, %v305_v43  ;;  %v667_v55 = vpop.f32.mrb[9].mxu1 }
 0x10d   : > { %v627_v54 = vadd.f32 %v626_v51, %v301_v44  ;;  %v628_v59 = vpop.f32.mrb[10].mxu0  ;;  %v833_v52 = vrot.slane %v819_v48, %v1181_v4  ;;  %v668_v61 = vadd.f32 %v667_v55, %v309_v46  ;;  %v669_v56 = vpop.f32.mrb[10].mxu1 }
 0x10e   : > { %v629_v57 = vpop.f32.mrb[11].mxu0  ;;  %v670_v62 = vpop.f32.mrb[11].mxu1 }
 0x10f   : > { %v992_v58 = vpack.c.bf16 %v627_v54, %v625_v49  ;;  %v834_v63 = vcombine.low %v826_v60, %v833_v52  ;;  %v993_v0 = vpack.c.bf16 %v668_v61, %v666_v53 }
 0x111   : > { %v845_v2 = vrot.slane %v992_v58, %v1181_v4  ;;  %886 = vst [vmem:[%s1198_s11] sm:$0xff] %v834_v63  ;;  %v852_v7 = vrot.slane %v993_v0, %v1181_v4 }
 0x113   : > { %v706_v9 = vpop.f32.mrb[12].mxu0  ;;  %v867_v12 = vcombine.low %v845_v2, %v852_v7  ;;  %v747_v14 = vpop.f32.mrb[12].mxu1 }
 0x114   : > { %v707_v13 = vadd.f32 %v706_v9, %v313_v1  ;;  %v708_v16 = vpop.f32.mrb[13].mxu0  ;;  %v748_v17 = vadd.f32 %v747_v14, %v321_v3  ;;  %v749_v19 = vpop.f32.mrb[13].mxu1 }
 0x115   : > { %v709_v18 = vadd.f32 %v708_v16, %v317_v6  ;;  %v710_v20 = vpop.f32.mrb[14].mxu0  ;;  %v750_v21 = vadd.f32 %v749_v19, %v325_v8  ;;  %v751_v5 = vpop.f32.mrb[14].mxu1  ;;  %v875_v26 = vrot.slane %v867_v12, %v1181_v4 }
 0x116   : > { %v711_v22 = vpop.f32.mrb[15].mxu0  ;;  %v752_v10 = vpop.f32.mrb[15].mxu1 }
 0x117   : > { %v994_v23 = vpack.c.bf16 %v709_v18, %v707_v13  ;;  %v995_v11 = vpack.c.bf16 %v750_v21, %v748_v17 }
 0x119   : > { %v859_v24 = vrot.slane %v994_v23, %v1181_v4  ;;  %v866_v15 = vrot.slane %v995_v11, %v1181_v4 }
 0x11b   : > { %v868_v25 = vcombine.low %v859_v24, %v866_v15 }
 0x11d   : > { %v882_v27 = vrot.slane %v868_v25, %v1181_v4 }
 0x11f   : > { %v883_v28 = vcombine.low %v875_v26, %v882_v27 }
 0x121   : > { %887 = vst [vmem:[%s1198_s11 + $0x8] sm:$0xff] %v883_v28 }
 0x122 PF: > { %p10_p9 = scmp.ge.s32.totalorder %s1088_s16, 10   ;;  %s1222_s12 = smov %s1043_s13 }
 0x123   : > { %s1223_s13 = smov %s1097_s19  ;;  %s1224_s14 = smov %s1088_s16 }
 0x124   :  { %12 = sbr.rel (!%p10_p9) target bundleno = 2 (0x2), region = 93 }

// kernel: discriminator_forward.4
= control target key start
LH: loop header
LB: loop body
LE: loop exit
PB: predicated region body
PF: predicated region fallthrough
CT: control target
= control target key end

     0   :  { %s2805_s15 = smov 0   ;;  %s3125_s0 = inlined_call_operand.vmem [shape: bf16[2048,108], index: 0, kind: input, shape index: {}]   ;;  %s3126_s1 = inlined_call_operand.vmem [shape: bf16[2048,36], index: 1, kind: input, shape index: {}]   ;;  %s3127_s2 = inlined_call_operand.vmem [shape: bf16[108,8], index: 2, kind: input, shape index: {}]   ;;  %s3128_s3 = inlined_call_operand.vmem [shape: bf16[36,8], index: 3, kind: input, shape index: {}]   ;;  %s3129_s4 = inlined_call_operand.vmem [shape: bf16[2048,8], index: 4, kind: output, shape index: {}]  }
   0x1 LB: > { %s2108_s16 = sadd.s32 4294967295, %s2778_s15   ;;  %p2112_p0 = scmp.ge.s32.totalorder %s2778_s15, 1  ;;  %s2778_s15 = sphi %s2805_s15, %s14_s15  }
   0x2   : > { %p174_p1 = scmp.lt.s32.totalorder %s2778_s15, 5 }
   0x4   : > { %p175_p2 = pnand %p2112_p0, %p174_p1 }
   0x5   : > { %v2698_v0 = vld [vmem:[%s3128_s3] sm:$0xff] (!%p175_p2)   ;;  %s2113_s21 = sshll.u32 (!%p175_p2), %s2108_s16, 6  ;;  %v2700_v2 = vld [vmem:[%s3128_s3 + $0x8] sm:$0xff] (!%p175_p2)   ;;  %v2702_v4 = vld [vmem:[%s3128_s3 + $0x10] ss:$0 sps:$4 sm:$0x33] (!%p175_p2)  }
   0x6   : > { %178 = sbr.rel (%p175_p2) target bundleno = 372 (0x174), region = 36  ;;  %v2699_v1 = vld [vmem:[%s3127_s2] sm:$0xff] (!%p175_p2)   ;;  %2461 = vmatprep.subr.bf16.mxu0 (!%p175_p2), %v2698_v0  ;;  %p206_p3 = scmp.lt.s32.totalorder (!%p175_p2), %s2113_s21, 255  ;;  %v2701_v3 = vld [vmem:[%s3127_s2 + $0x8] sm:$0xff] (!%p175_p2)   ;;  %vm643_vm0 = vcmask (!%p175_p2), 1041408   ;;  %v2703_v5 = vld [vmem:[%s3127_s2 + $0x10] sm:$0xff] (!%p175_p2)  }
   0x7   : > { %2609 = vmatprep.subr.bf16.mxu1 (!%p175_p2), %v2699_v1  ;;  %2462 = vmatpush3.bf16.msra.mxu0 (!%p175_p2), %v2698_v0  ;;  %vm546_vm1 = vcmask (!%p175_p2), 293888   ;;  %v645_v6 = vsel (!%p175_p2), %vm643_vm0, %v2702_v4, 0  ;;  %v2706_v7 = vld [vmem:[%s3127_s2 + $0x18] sm:$0xff] (!%p175_p2)   ;;  %v2707_v11 = vld [vmem:[%s3127_s2 + $0x20] sm:$0xff] (!%p175_p2)   ;;  %vm1137_vm2 = vcmask (!%p175_p2), 883712   ;;  %v2710_v13 = vld [vmem:[%s3127_s2 + $0x28] sm:$0xff] (!%p175_p2)  }
   0x8   : > { %2616 = vmatpush3.bf16.msra.mxu1 (!%p175_p2), %v2699_v1  ;;  %2463 = vmatprep.subr.bf16.mxu0 (!%p175_p2), %v2700_v2  ;;  %v2711_v16 = vld [vmem:[%s3127_s2 + $0x30] sm:$0x3f] (!%p175_p2)   ;;  %vm1234_vm3 = vcmask (!%p175_p2), 1045504   ;;  %vm1975_vm6 = vcmask (!%p175_p2), 60416  }
   0x9   : > { %2610 = vmatprep.subr.bf16.mxu1 (!%p175_p2), %v2701_v3  ;;  %v1236_v17 = vsel (!%p175_p2), %vm1234_vm3, %v2711_v16, 0 }
   0xb   : > { %2464 = vmatpush3.bf16.msra.mxu0 (!%p175_p2), %v2700_v2 }
   0xc   : > { %2617 = vmatpush3.bf16.msra.mxu1 (!%p175_p2), %v2701_v3  ;;  %2687 = vmatprep.subr.msk.bf16.mxu0 (!%p175_p2), %vm643_vm0, %v2702_v4 }
   0xd   : > { %s3131_s21 = smov (!%p206_p3, %s2113_s21), 255  ;;  %2611 = vmatprep.subr.bf16.mxu1 %v2703_v5 }
   0xe   : > { %s2831_s30 = sshll.u32 %s3131_s21, 2 }
   0xf   : > { %s2840_s9 = scalar_lea.vmem %s3126_s1, %s2831_s30  ;;  %2466 = vmatpush3.bf16.msra.mxu0 %v645_v6  ;;  %s2850_s12 = scalar_lea.vmem %s3125_s0, %s2831_s30 }
  0x10   : > { %v2704_v8 = vld [vmem:[%s2840_s9] sm:$0xff]   ;;  %v2705_v9 = vld [vmem:[%s2840_s9 + $0x8] sm:$0xff]   ;;  %v2708_v10 = vld [vmem:[%s2840_s9 + $0x10] sm:$0xff]   ;;  %2618 = vmatpush3.bf16.msra.mxu1 %v2703_v5  ;;  %2531 = vmatprep.subr.bf16.mxu0 %v2699_v1  ;;  %s2992_s22 = scalar_lea.vmem %s3129_s4, %s2831_s30 }
  0x11   : > { %2467 = vmatprep.mubr.msk.bf16.mxu0 %vm546_vm1, %v2704_v8  ;;  %2612 = vmatprep.subr.bf16.mxu1 %v2706_v7  ;;  %v2713_v12 = vld [vmem:[%s2850_s12 + $0x10] sm:$0xff]   ;;  %v2709_v14 = vld [vmem:[%s2840_s9 + $0x18] sm:$0xff]   ;;  %v2712_v15 = vld [vmem:[%s2840_s9 + $0x20] sm:$0xff]  }
  0x12   : > { %2468 = vmatmul.mubr.msk.bf16.vlgmr.msra.gmra.mrb[0].mxu0 %vm546_vm1, %v2705_v9  ;;  %2549 = vmatprep.mubr.msk.bf16.mxu1 %vm1137_vm2, %v2713_v12  ;;  %v2714_v18 = vld [vmem:[%s2840_s9 + $0x28] sm:$0xff]   ;;  %v2715_v19 = vld [vmem:[%s2850_s12 + $0x18] sm:$0xff]   ;;  %v2716_v20 = vld [vmem:[%s2840_s9 + $0x30] sm:$0xff]  }
  0x13   : > { %2532 = vmatpush3.bf16.msra.mxu0 %v2699_v1  ;;  %2471 = vmatprep.mubr.msk.bf16.mxu0 %vm546_vm1, %v2708_v10  ;;  %v2717_v21 = vld [vmem:[%s2850_s12 + $0x20] sm:$0xff]   ;;  %v2718_v22 = vld [vmem:[%s2840_s9 + $0x38] sm:$0xff]   ;;  %v2719_v23 = vld [vmem:[%s2850_s12 + $0x28] sm:$0xff]  }
  0x14   : > { %2619 = vmatpush3.bf16.msra.mxu1 %v2706_v7  ;;  %2533 = vmatprep.subr.bf16.mxu0 %v2701_v3  ;;  %v2720_v24 = vld [vmem:[%s2840_s9 + $0x40] sm:$0xff]   ;;  %v2721_v25 = vld [vmem:[%s2850_s12 + $0x30] sm:$0xff]   ;;  %v2722_v26 = vld [vmem:[%s2840_s9 + $0x48] sm:$0xff]  }
  0x15   : > { %2613 = vmatprep.subr.bf16.mxu1 %v2707_v11  ;;  %v2723_v27 = vld [vmem:[%s2850_s12 + $0x38] sm:$0xff]   ;;  %v2724_v28 = vld [vmem:[%s2840_s9 + $0x50] sm:$0xff]   ;;  %v2725_v29 = vld [vmem:[%s2850_s12 + $0x40] sm:$0xff]  }
  0x16   : > { %v2726_v30 = vld [vmem:[%s2840_s9 + $0x58] sm:$0xff]   ;;  %v2727_v31 = vld [vmem:[%s2850_s12 + $0x48] sm:$0xff]   ;;  %v2728_v32 = vld [vmem:[%s2840_s9 + $0x60] sm:$0xff]  }
  0x17   : > { %2534 = vmatpush3.bf16.msra.mxu0 %v2701_v3  ;;  %v2729_v33 = vld [vmem:[%s2850_s12 + $0x50] sm:$0xff]   ;;  %v2730_v34 = vld [vmem:[%s2840_s9 + $0x68] sm:$0xff]   ;;  %v2731_v35 = vld [vmem:[%s2850_s12 + $0x58] sm:$0xff]  }
  0x18   : > { %2620 = vmatpush3.bf16.msra.mxu1 %v2707_v11  ;;  %2535 = vmatprep.subr.bf16.mxu0 %v2703_v5  ;;  %v2732_v36 = vld [vmem:[%s2840_s9 + $0x70] sm:$0xff]   ;;  %v2733_v37 = vld [vmem:[%s2850_s12 + $0x60] sm:$0xff]   ;;  %v2734_v38 = vld [vmem:[%s2840_s9 + $0x78] sm:$0xff]  }
  0x19   : > { %2614 = vmatprep.subr.bf16.mxu1 %v2710_v13  ;;  %v2735_v39 = vld [vmem:[%s2850_s12 + $0x68] sm:$0xff]   ;;  %v2736_v40 = vld [vmem:[%s2840_s9 + $0x80] sm:$0xff]   ;;  %v2737_v41 = vld [vmem:[%s2850_s12 + $0x70] sm:$0xff]  }
  0x1a   : > { %2472 = vmatmul.mubr.msk.bf16.gmra.mrb[4].mxu0 %vm546_vm1, %v2709_v14  ;;  %v2738_v42 = vld [vmem:[%s2840_s9 + $0x88] sm:$0xff]   ;;  %v2739_v43 = vld [vmem:[%s2850_s12 + $0x78] sm:$0xff]   ;;  %v2740_v44 = vld [vmem:[%s2840_s9 + $0x90] sm:$0xff]  }
  0x1b   : > { %2475 = vmatprep.mubr.msk.bf16.mxu0 %vm546_vm1, %v2712_v15  ;;  %2536 = vmatpush3.bf16.msra.mxu0 %v2703_v5  ;;  %v2741_v45 = vld [vmem:[%s2850_s12 + $0x80] sm:$0xff]   ;;  %v2742_v46 = vld [vmem:[%s2840_s9 + $0x98] sm:$0xff]   ;;  %v2743_v47 = vld [vmem:[%s2850_s12 + $0x88] sm:$0xff]  }
  0x1c   : > { %2621 = vmatpush3.bf16.msra.mxu1 %v2710_v13  ;;  %2537 = vmatprep.subr.bf16.mxu0 %v2706_v7  ;;  %v2744_v48 = vld [vmem:[%s2840_s9 + $0xa0] sm:$0xff]   ;;  %v2745_v49 = vld [vmem:[%s2850_s12 + $0x90] sm:$0xff]   ;;  %v2746_v50 = vld [vmem:[%s2840_s9 + $0xa8] sm:$0xff]  }
  0x1d   : > { %2689 = vmatprep.subr.msk.bf16.mxu1 %vm1234_vm3, %v2711_v16  ;;  %v2747_v51 = vld [vmem:[%s2850_s12 + $0x98] sm:$0xff]   ;;  %v2748_v52 = vld [vmem:[%s2840_s9 + $0xb0] sm:$0xff]   ;;  %v2749_v53 = vld [vmem:[%s2850_s12 + $0xa0] sm:$0xff]  }
  0x1e   : > { %v2750_v54 = vld [vmem:[%s2840_s9 + $0xb8] sm:$0xff]   ;;  %v2751_v55 = vld [vmem:[%s2850_s12 + $0xa8] sm:$0xff]   ;;  %v2752_v56 = vld [vmem:[%s2840_s9 + $0xc0] sm:$0xff]  }
  0x1f   : > { %2538 = vmatpush3.bf16.msra.mxu0 %v2706_v7  ;;  %v2753_v57 = vld [vmem:[%s2850_s12 + $0xb0] sm:$0xff]   ;;  %v2754_v58 = vld [vmem:[%s2840_s9 + $0xc8] sm:$0xff]   ;;  %v2755_v59 = vld [vmem:[%s2850_s12 + $0xb8] sm:$0xff]  }
  0x20   : > { %2622 = vmatpush3.bf16.msra.mxu1 %v1236_v17  ;;  %2539 = vmatprep.subr.bf16.mxu0 %v2707_v11  ;;  %v2756_v60 = vld [vmem:[%s2840_s9 + $0xd0] sm:$0xff]   ;;  %v2757_v61 = vld [vmem:[%s2850_s12 + $0xc0] sm:$0xff]   ;;  %v2758_v62 = vld [vmem:[%s2840_s9 + $0xd8] sm:$0xff]  }
  0x21   : > { %v2759_v63 = vld [vmem:[%s2850_s12 + $0xc8] sm:$0xff]   ;;  %v2760_v0 = vld [vmem:[%s2840_s9 + $0xe0] sm:$0xff]   ;;  %v2761_v1 = vld [vmem:[%s2850_s12 + $0xd0] sm:$0xff]  }
  0x22   : > { %2476 = vmatmul.mubr.msk.bf16.gmra.mrb[8].mxu0 %vm546_vm1, %v2714_v18  ;;  %v2762_v2 = vld [vmem:[%s2840_s9 + $0xe8] sm:$0xff]   ;;  %v2763_v3 = vld [vmem:[%s2850_s12 + $0xd8] sm:$0xff]   ;;  %v2764_v4 = vld [vmem:[%s2840_s9 + $0xf0] sm:$0xff]  }
  0x23   : > { %2550 = vmatmul.mubr.msk.bf16.vlgmr.msra.gmra.mrb[0].mxu1 %vm1137_vm2, %v2715_v19  ;;  %2479 = vmatprep.mubr.msk.bf16.mxu0 %vm546_vm1, %v2716_v20  ;;  %v2765_v5 = vld [vmem:[%s2850_s12 + $0xe0] sm:$0xff]   ;;  %v2766_v6 = vld [vmem:[%s2840_s9 + $0xf8] sm:$0xff]   ;;  %v2767_v7 = vld [vmem:[%s2850_s12 + $0xe8] sm:$0xff]  }
  0x24   : > { %2553 = vmatprep.mubr.msk.bf16.mxu1 %vm1137_vm2, %v2717_v21  ;;  %2540 = vmatpush3.bf16.msra.mxu0 %v2707_v11  ;;  %v2768_v8 = vld [vmem:[%s2850_s12] sm:$0xff]   ;;  %v2769_v9 = vld [vmem:[%s2850_s12 + $0xf0] sm:$0xff]   ;;  %v2770_v10 = vld [vmem:[%s2850_s12 + $0x8] sm:$0xff]  }
  0x25   : > { %2541 = vmatprep.subr.bf16.mxu0 %v2710_v13  ;;  %v2771_v11 = vld [vmem:[%s2850_s12 + $0xf8] sm:$0xff]  }
  0x28   : > { %2542 = vmatpush3.bf16.msra.mxu0 %v2710_v13 }
  0x29   : > { %2688 = vmatprep.subr.msk.bf16.mxu0 %vm1234_vm3, %v2711_v16 }
  0x2a   : > { %2480 = vmatmul.mubr.msk.bf16.gmra.mrb[12].mxu0 %vm546_vm1, %v2718_v22 }
  0x2b   : > { %2554 = vmatmul.mubr.msk.bf16.gmra.mrb[4].mxu1 %vm1137_vm2, %v2719_v23  ;;  %2483 = vmatprep.mubr.msk.bf16.mxu0 %vm546_vm1, %v2720_v24 }
  0x2c   : > { %2557 = vmatprep.mubr.msk.bf16.mxu1 %vm1137_vm2, %v2721_v25  ;;  %2544 = vmatpush3.bf16.msra.mxu0 %v1236_v17 }
  0x32   : > { %2484 = vmatmul.mubr.msk.bf16.gmra.mrb[16].mxu0 %vm546_vm1, %v2722_v26 }
  0x33   : > { %2558 = vmatmul.mubr.msk.bf16.gmra.mrb[8].mxu1 %vm1137_vm2, %v2723_v27  ;;  %2487 = vmatprep.mubr.msk.bf16.mxu0 %vm546_vm1, %v2724_v28 }
  0x34   : > { %2561 = vmatprep.mubr.msk.bf16.mxu1 %vm1137_vm2, %v2725_v29 }
  0x3a   : > { %2488 = vmatmul.mubr.msk.bf16.gmra.mrb[20].mxu0 %vm546_vm1, %v2726_v30 }
  0x3b   : > { %2562 = vmatmul.mubr.msk.bf16.gmra.mrb[12].mxu1 %vm1137_vm2, %v2727_v31  ;;  %2491 = vmatprep.mubr.msk.bf16.mxu0 %vm546_vm1, %v2728_v32 }
  0x3c   : > { %2565 = vmatprep.mubr.msk.bf16.mxu1 %vm1137_vm2, %v2729_v33 }
  0x42   : > { %2492 = vmatmul.mubr.msk.bf16.gmra.mrb[24].mxu0 %vm546_vm1, %v2730_v34 }
  0x43   : > { %2566 = vmatmul.mubr.msk.bf16.gmra.mrb[16].mxu1 %vm1137_vm2, %v2731_v35  ;;  %2495 = vmatprep.mubr.msk.bf16.mxu0 %vm546_vm1, %v2732_v36 }
  0x44   : > { %2569 = vmatprep.mubr.msk.bf16.mxu1 %vm1137_vm2, %v2733_v37 }
  0x4a   : > { %2496 = vmatmul.mubr.msk.bf16.gmra.mrb[28].mxu0 %vm546_vm1, %v2734_v38 }
  0x4b   : > { %2570 = vmatmul.mubr.msk.bf16.gmra.mrb[20].mxu1 %vm1137_vm2, %v2735_v39  ;;  %2499 = vmatprep.mubr.msk.bf16.mxu0 %vm546_vm1, %v2736_v40 }
  0x4c   : > { %2573 = vmatprep.mubr.msk.bf16.mxu1 %vm1137_vm2, %v2737_v41 }
  0x52   : > { %2500 = vmatmul.mubr.msk.bf16.gmra.mrb[32].mxu0 %vm546_vm1, %v2738_v42 }
  0x53   : > { %2574 = vmatmul.mubr.msk.bf16.gmra.mrb[24].mxu1 %vm1137_vm2, %v2739_v43  ;;  %2503 = vmatprep.mubr.msk.bf16.mxu0 %vm546_vm1, %v2740_v44 }
  0x54   : > { %2577 = vmatprep.mubr.msk.bf16.mxu1 %vm1137_vm2, %v2741_v45 }
  0x5a   : > { %2504 = vmatmul.mubr.msk.bf16.gmra.mrb[36].mxu0 %vm546_vm1, %v2742_v46 }
  0x5b   : > { %2578 = vmatmul.mubr.msk.bf16.gmra.mrb[28].mxu1 %vm1137_vm2, %v2743_v47  ;;  %2507 = vmatprep.mubr.msk.bf16.mxu0 %vm546_vm1, %v2744_v48 }
  0x5c   : > { %2581 = vmatprep.mubr.msk.bf16.mxu1 %vm1137_vm2, %v2745_v49 }
  0x62   : > { %2508 = vmatmul.mubr.msk.bf16.gmra.mrb[40].mxu0 %vm546_vm1, %v2746_v50 }
  0x63   : > { %2582 = vmatmul.mubr.msk.bf16.gmra.mrb[32].mxu1 %vm1137_vm2, %v2747_v51  ;;  %2511 = vmatprep.mubr.msk.bf16.mxu0 %vm546_vm1, %v2748_v52 }
  0x64   : > { %2585 = vmatprep.mubr.msk.bf16.mxu1 %vm1137_vm2, %v2749_v53 }
  0x6a   : > { %2512 = vmatmul.mubr.msk.bf16.gmra.mrb[44].mxu0 %vm546_vm1, %v2750_v54 }
  0x6b   : > { %2586 = vmatmul.mubr.msk.bf16.gmra.mrb[36].mxu1 %vm1137_vm2, %v2751_v55  ;;  %2515 = vmatprep.mubr.msk.bf16.mxu0 %vm546_vm1, %v2752_v56 }
  0x6c   : > { %2589 = vmatprep.mubr.msk.bf16.mxu1 %vm1137_vm2, %v2753_v57 }
  0x72   : > { %2516 = vmatmul.mubr.msk.bf16.gmra.mrb[48].mxu0 %vm546_vm1, %v2754_v58 }
  0x73   : > { %2590 = vmatmul.mubr.msk.bf16.gmra.mrb[40].mxu1 %vm1137_vm2, %v2755_v59  ;;  %2519 = vmatprep.mubr.msk.bf16.mxu0 %vm546_vm1, %v2756_v60 }
  0x74   : > { %2593 = vmatprep.mubr.msk.bf16.mxu1 %vm1137_vm2, %v2757_v61 }
  0x7a   : > { %2520 = vmatmul.mubr.msk.bf16.gmra.mrb[52].mxu0 %vm546_vm1, %v2758_v62 }
  0x7b   : > { %2594 = vmatmul.mubr.msk.bf16.gmra.mrb[44].mxu1 %vm1137_vm2, %v2759_v63  ;;  %2523 = vmatprep.mubr.msk.bf16.mxu0 %vm546_vm1, %v2760_v0 }
  0x7c   : > { %2597 = vmatprep.mubr.msk.bf16.mxu1 %vm1137_vm2, %v2761_v1 }
  0x82   : > { %2524 = vmatmul.mubr.msk.bf16.gmra.mrb[56].mxu0 %vm546_vm1, %v2762_v2 }
  0x83   : > { %2598 = vmatmul.mubr.msk.bf16.gmra.mrb[48].mxu1 %vm1137_vm2, %v2763_v3  ;;  %2527 = vmatprep.mubr.msk.bf16.mxu0 %vm546_vm1, %v2764_v4 }
  0x84   : > { %2601 = vmatprep.mubr.msk.bf16.mxu1 %vm1137_vm2, %v2765_v5 }
  0x8a   : > { %2528 = vmatmul.mubr.msk.bf16.gmra.mrb[60].mxu0 %vm546_vm1, %v2766_v6 }
  0x8b   : > { %2602 = vmatmul.mubr.msk.bf16.gmra.mrb[52].mxu1 %vm1137_vm2, %v2767_v7  ;;  %2545 = vmatprep.mubr.msk.bf16.mxu0 %vm1137_vm2, %v2768_v8 }
  0x8c   : > { %2605 = vmatprep.mubr.msk.bf16.mxu1 %vm1137_vm2, %v2769_v9 }
  0x92   : > { %2546 = vmatmul.mubr.msk.bf16.vlgmr.msra.gmra.mrb[0].mxu0 %vm1137_vm2, %v2770_v10 }
  0x93   : > { %2606 = vmatmul.mubr.msk.bf16.gmra.mrb[56].mxu1 %vm1137_vm2, %v2771_v11 }
  0xed   : > { %v2473_v12 = vpop.f32.mrb[4].mxu0 }
  0xee   : > { %v697_v13 = vpop.f32.mrb[5].mxu0 }
  0xef   : > { %v2474_v14 = vpop.f32.mrb[6].mxu0 }
  0xf0   : > { %v700_v15 = vpop.f32.mrb[7].mxu0 }
  0xf5   : > { %v2477_v16 = vpop.f32.mrb[8].mxu0 }
  0xf6   : > { %v2551_v17 = vpop.f32.mrb[0].mxu1  ;;  %v713_v18 = vpop.f32.mrb[9].mxu0 }
  0xf7   : > { %v1297_v19 = vadd.f32 %v2551_v17, %v2473_v12  ;;  %v1288_v20 = vpop.f32.mrb[1].mxu1  ;;  %v2478_v21 = vpop.f32.mrb[10].mxu0 }
  0xf8   : > { %v1289_v22 = vadd.f32 %v1288_v20, %v697_v13  ;;  %v2552_v23 = vpop.f32.mrb[2].mxu1  ;;  %v716_v24 = vpop.f32.mrb[11].mxu0 }
  0xf9   : > { %vm1533_vm4 = vcmp.ge.f32.partialorder %v1297_v19, 0.0  ;;  %v1597_v25 = vmul.f32 0.2, %v1297_v19  ;;  %v1300_v26 = vadd.f32 %v2552_v23, %v2474_v14  ;;  %v1291_v27 = vpop.f32.mrb[3].mxu1 }
  0xfa   : > { %vm1531_vm5 = vcmp.ge.f32.partialorder %v1289_v22, 0.0  ;;  %v1595_v28 = vmul.f32 0.2, %v1289_v22  ;;  %v1292_v29 = vadd.f32 %v1291_v27, %v700_v15 }
  0xfb   : > { %v1661_v30 = vsel %vm1533_vm4, %v1297_v19, %v1597_v25  ;;  %vm1534_vm7 = vcmp.ge.f32.partialorder %v1300_v26, 0.0  ;;  %v1598_v31 = vmul.f32 0.2, %v1300_v26 }
  0xfc   : > { %v2329_v32 = vpack.c.bf16 %v1661_v30, %v1661_v30  ;;  %v1659_v33 = vsel %vm1531_vm5, %v1289_v22, %v1595_v28  ;;  %vm1532_vm8 = vcmp.ge.f32.partialorder %v1292_v29, 0.0  ;;  %v1596_v34 = vmul.f32 0.2, %v1292_v29 }
  0xfd   : > { %v2327_v35 = vpack.c.bf16 %v1659_v33, %v1659_v33  ;;  %v1662_v36 = vsel %vm1534_vm7, %v1300_v26, %v1598_v31  ;;  %v2481_v37 = vpop.f32.mrb[12].mxu0 }
  0xfe   : > { %1982 = vst.msk [vmem:[%s2992_s22 + $0x18] sm:$0xf] %vm1975_vm6, %v2329_v32  ;;  %v2330_v38 = vpack.c.bf16 %v1662_v36, %v1662_v36  ;;  %v1660_v39 = vsel %vm1532_vm8, %v1292_v29, %v1596_v34  ;;  %v2555_v40 = vpop.f32.mrb[4].mxu1  ;;  %v729_v41 = vpop.f32.mrb[13].mxu0 }
  0xff   : > { %1980 = vst.msk [vmem:[%s2992_s22 + $0x10] sm:$0xf] %vm1975_vm6, %v2327_v35  ;;  %v2328_v42 = vpack.c.bf16 %v1660_v39, %v1660_v39  ;;  %v1313_v43 = vadd.f32 %v2555_v40, %v2477_v16  ;;  %v1304_v44 = vpop.f32.mrb[5].mxu1  ;;  %v2482_v45 = vpop.f32.mrb[14].mxu0 }
 0x100   : > { %1983 = vst.msk [vmem:[%s2992_s22 + $0x1c] sm:$0xf] %vm1975_vm6, %v2330_v38  ;;  %v1305_v46 = vadd.f32 %v1304_v44, %v713_v18  ;;  %v2556_v47 = vpop.f32.mrb[6].mxu1  ;;  %v732_v48 = vpop.f32.mrb[15].mxu0 }
 0x101   : > { %1981 = vst.msk [vmem:[%s2992_s22 + $0x14] sm:$0xf] %vm1975_vm6, %v2328_v42  ;;  %vm1537_vm9 = vcmp.ge.f32.partialorder %v1313_v43, 0.0  ;;  %v1601_v49 = vmul.f32 0.2, %v1313_v43  ;;  %v1316_v50 = vadd.f32 %v2556_v47, %v2478_v21  ;;  %v1307_v51 = vpop.f32.mrb[7].mxu1 }
 0x102   : > { %vm1535_vm10 = vcmp.ge.f32.partialorder %v1305_v46, 0.0  ;;  %v1599_v52 = vmul.f32 0.2, %v1305_v46  ;;  %v1308_v53 = vadd.f32 %v1307_v51, %v716_v24 }
 0x103   : > { %v1665_v54 = vsel %vm1537_vm9, %v1313_v43, %v1601_v49  ;;  %vm1538_vm11 = vcmp.ge.f32.partialorder %v1316_v50, 0.0  ;;  %v1602_v55 = vmul.f32 0.2, %v1316_v50 }
 0x104   : > { %v2333_v56 = vpack.c.bf16 %v1665_v54, %v1665_v54  ;;  %v1663_v57 = vsel %vm1535_vm10, %v1305_v46, %v1599_v52  ;;  %vm1536_vm12 = vcmp.ge.f32.partialorder %v1308_v53, 0.0  ;;  %v1600_v58 = vmul.f32 0.2, %v1308_v53 }
 0x105   : > { %v2331_v59 = vpack.c.bf16 %v1663_v57, %v1663_v57  ;;  %v1666_v60 = vsel %vm1538_vm11, %v1316_v50, %v1602_v55  ;;  %v2485_v61 = vpop.f32.mrb[16].mxu0 }
 0x106   : > { %1986 = vst.msk [vmem:[%s2992_s22 + $0x28] sm:$0xf] %vm1975_vm6, %v2333_v56  ;;  %v2334_v62 = vpack.c.bf16 %v1666_v60, %v1666_v60  ;;  %v1664_v63 = vsel %vm1536_vm12, %v1308_v53, %v1600_v58  ;;  %v2559_v0 = vpop.f32.mrb[8].mxu1  ;;  %v745_v1 = vpop.f32.mrb[17].mxu0 }
 0x107   : > { %1984 = vst.msk [vmem:[%s2992_s22 + $0x20] sm:$0xf] %vm1975_vm6, %v2331_v59  ;;  %v2332_v2 = vpack.c.bf16 %v1664_v63, %v1664_v63  ;;  %v1329_v3 = vadd.f32 %v2559_v0, %v2481_v37  ;;  %v1320_v4 = vpop.f32.mrb[9].mxu1  ;;  %v2486_v5 = vpop.f32.mrb[18].mxu0 }
 0x108   : > { %1987 = vst.msk [vmem:[%s2992_s22 + $0x2c] sm:$0xf] %vm1975_vm6, %v2334_v62  ;;  %v1321_v6 = vadd.f32 %v1320_v4, %v729_v41  ;;  %v2560_v7 = vpop.f32.mrb[10].mxu1  ;;  %v748_v8 = vpop.f32.mrb[19].mxu0 }
 0x109   : > { %1985 = vst.msk [vmem:[%s2992_s22 + $0x24] sm:$0xf] %vm1975_vm6, %v2332_v2  ;;  %vm1541_vm13 = vcmp.ge.f32.partialorder %v1329_v3, 0.0  ;;  %v1605_v9 = vmul.f32 0.2, %v1329_v3  ;;  %v1332_v10 = vadd.f32 %v2560_v7, %v2482_v45  ;;  %v1323_v11 = vpop.f32.mrb[11].mxu1 }
 0x10a   : > { %vm1539_vm14 = vcmp.ge.f32.partialorder %v1321_v6, 0.0  ;;  %v1603_v12 = vmul.f32 0.2, %v1321_v6  ;;  %v1324_v13 = vadd.f32 %v1323_v11, %v732_v48 }
 0x10b   : > { %v1669_v14 = vsel %vm1541_vm13, %v1329_v3, %v1605_v9  ;;  %vm1542_vm15 = vcmp.ge.f32.partialorder %v1332_v10, 0.0  ;;  %v1606_v15 = vmul.f32 0.2, %v1332_v10 }
 0x10c   : > { %v2337_v16 = vpack.c.bf16 %v1669_v14, %v1669_v14  ;;  %v1667_v17 = vsel %vm1539_vm14, %v1321_v6, %v1603_v12  ;;  %vm1540_vm0 = vcmp.ge.f32.partialorder %v1324_v13, 0.0  ;;  %v1604_v18 = vmul.f32 0.2, %v1324_v13 }
 0x10d   : > { %v2335_v19 = vpack.c.bf16 %v1667_v17, %v1667_v17  ;;  %v1670_v20 = vsel %vm1542_vm15, %v1332_v10, %v1606_v15  ;;  %v2489_v21 = vpop.f32.mrb[20].mxu0 }
 0x10e   : > { %1990 = vst.msk [vmem:[%s2992_s22 + $0x38] sm:$0xf] %vm1975_vm6, %v2337_v16  ;;  %v2338_v22 = vpack.c.bf16 %v1670_v20, %v1670_v20  ;;  %v1668_v23 = vsel %vm1540_vm0, %v1324_v13, %v1604_v18  ;;  %v2563_v24 = vpop.f32.mrb[12].mxu1  ;;  %v761_v25 = vpop.f32.mrb[21].mxu0 }
 0x10f   : > { %1988 = vst.msk [vmem:[%s2992_s22 + $0x30] sm:$0xf] %vm1975_vm6, %v2335_v19  ;;  %v2336_v26 = vpack.c.bf16 %v1668_v23, %v1668_v23  ;;  %v1345_v27 = vadd.f32 %v2563_v24, %v2485_v61  ;;  %v1336_v28 = vpop.f32.mrb[13].mxu1  ;;  %v2490_v29 = vpop.f32.mrb[22].mxu0 }
 0x110   : > { %1991 = vst.msk [vmem:[%s2992_s22 + $0x3c] sm:$0xf] %vm1975_vm6, %v2338_v22  ;;  %v1337_v30 = vadd.f32 %v1336_v28, %v745_v1  ;;  %v2564_v31 = vpop.f32.mrb[14].mxu1  ;;  %v764_v32 = vpop.f32.mrb[23].mxu0 }
 0x111   : > { %1989 = vst.msk [vmem:[%s2992_s22 + $0x34] sm:$0xf] %vm1975_vm6, %v2336_v26  ;;  %vm1545_vm1 = vcmp.ge.f32.partialorder %v1345_v27, 0.0  ;;  %v1609_v33 = vmul.f32 0.2, %v1345_v27  ;;  %v1348_v34 = vadd.f32 %v2564_v31, %v2486_v5  ;;  %v1339_v35 = vpop.f32.mrb[15].mxu1 }
 0x112   : > { %vm1543_vm2 = vcmp.ge.f32.partialorder %v1337_v30, 0.0  ;;  %v1607_v36 = vmul.f32 0.2, %v1337_v30  ;;  %v1340_v37 = vadd.f32 %v1339_v35, %v748_v8 }
 0x113   : > { %v1673_v38 = vsel %vm1545_vm1, %v1345_v27, %v1609_v33  ;;  %vm1546_vm3 = vcmp.ge.f32.partialorder %v1348_v34, 0.0  ;;  %v1610_v39 = vmul.f32 0.2, %v1348_v34 }
 0x114   : > { %v2341_v40 = vpack.c.bf16 %v1673_v38, %v1673_v38  ;;  %v1671_v41 = vsel %vm1543_vm2, %v1337_v30, %v1607_v36  ;;  %vm1544_vm4 = vcmp.ge.f32.partialorder %v1340_v37, 0.0  ;;  %v1608_v42 = vmul.f32 0.2, %v1340_v37 }
 0x115   : > { %v2339_v43 = vpack.c.bf16 %v1671_v41, %v1671_v41  ;;  %v1674_v44 = vsel %vm1546_vm3, %v1348_v34, %v1610_v39  ;;  %v2493_v45 = vpop.f32.mrb[24].mxu0 }
 0x116   : > { %1994 = vst.msk [vmem:[%s2992_s22 + $0x48] sm:$0xf] %vm1975_vm6, %v2341_v40  ;;  %v2342_v46 = vpack.c.bf16 %v1674_v44, %v1674_v44  ;;  %v1672_v47 = vsel %vm1544_vm4, %v1340_v37, %v1608_v42  ;;  %v2567_v48 = vpop.f32.mrb[16].mxu1  ;;  %v777_v49 = vpop.f32.mrb[25].mxu0 }
 0x117   : > { %1992 = vst.msk [vmem:[%s2992_s22 + $0x40] sm:$0xf] %vm1975_vm6, %v2339_v43  ;;  %v2340_v50 = vpack.c.bf16 %v1672_v47, %v1672_v47  ;;  %v1361_v51 = vadd.f32 %v2567_v48, %v2489_v21  ;;  %v1352_v52 = vpop.f32.mrb[17].mxu1  ;;  %v2494_v53 = vpop.f32.mrb[26].mxu0 }
 0x118   : > { %1995 = vst.msk [vmem:[%s2992_s22 + $0x4c] sm:$0xf] %vm1975_vm6, %v2342_v46  ;;  %v1353_v54 = vadd.f32 %v1352_v52, %v761_v25  ;;  %v2568_v55 = vpop.f32.mrb[18].mxu1  ;;  %v780_v56 = vpop.f32.mrb[27].mxu0 }
 0x119   : > { %1993 = vst.msk [vmem:[%s2992_s22 + $0x44] sm:$0xf] %vm1975_vm6, %v2340_v50  ;;  %vm1549_vm5 = vcmp.ge.f32.partialorder %v1361_v51, 0.0  ;;  %v1613_v57 = vmul.f32 0.2, %v1361_v51  ;;  %v1364_v58 = vadd.f32 %v2568_v55, %v2490_v29  ;;  %v1355_v59 = vpop.f32.mrb[19].mxu1 }
 0x11a   : > { %vm1547_vm7 = vcmp.ge.f32.partialorder %v1353_v54, 0.0  ;;  %v1611_v60 = vmul.f32 0.2, %v1353_v54  ;;  %v1356_v61 = vadd.f32 %v1355_v59, %v764_v32 }
 0x11b   : > { %v1677_v62 = vsel %vm1549_vm5, %v1361_v51, %v1613_v57  ;;  %vm1550_vm8 = vcmp.ge.f32.partialorder %v1364_v58, 0.0  ;;  %v1614_v63 = vmul.f32 0.2, %v1364_v58 }
 0x11c   : > { %v2345_v0 = vpack.c.bf16 %v1677_v62, %v1677_v62  ;;  %v1675_v1 = vsel %vm1547_vm7, %v1353_v54, %v1611_v60  ;;  %vm1548_vm9 = vcmp.ge.f32.partialorder %v1356_v61, 0.0  ;;  %v1612_v2 = vmul.f32 0.2, %v1356_v61 }
 0x11d   : > { %v2343_v3 = vpack.c.bf16 %v1675_v1, %v1675_v1  ;;  %v1678_v4 = vsel %vm1550_vm8, %v1364_v58, %v1614_v63  ;;  %v2497_v5 = vpop.f32.mrb[28].mxu0 }
 0x11e   : > { %1998 = vst.msk [vmem:[%s2992_s22 + $0x58] sm:$0xf] %vm1975_vm6, %v2345_v0  ;;  %v2346_v6 = vpack.c.bf16 %v1678_v4, %v1678_v4  ;;  %v1676_v7 = vsel %vm1548_vm9, %v1356_v61, %v1612_v2  ;;  %v2571_v8 = vpop.f32.mrb[20].mxu1  ;;  %v793_v9 = vpop.f32.mrb[29].mxu0 }
 0x11f   : > { %1996 = vst.msk [vmem:[%s2992_s22 + $0x50] sm:$0xf] %vm1975_vm6, %v2343_v3  ;;  %v2344_v10 = vpack.c.bf16 %v1676_v7, %v1676_v7  ;;  %v1377_v11 = vadd.f32 %v2571_v8, %v2493_v45  ;;  %v1368_v12 = vpop.f32.mrb[21].mxu1  ;;  %v2498_v13 = vpop.f32.mrb[30].mxu0 }
 0x120   : > { %1999 = vst.msk [vmem:[%s2992_s22 + $0x5c] sm:$0xf] %vm1975_vm6, %v2346_v6  ;;  %v1369_v14 = vadd.f32 %v1368_v12, %v777_v49  ;;  %v2572_v15 = vpop.f32.mrb[22].mxu1  ;;  %v796_v16 = vpop.f32.mrb[31].mxu0 }
 0x121   : > { %1997 = vst.msk [vmem:[%s2992_s22 + $0x54] sm:$0xf] %vm1975_vm6, %v2344_v10  ;;  %vm1553_vm10 = vcmp.ge.f32.partialorder %v1377_v11, 0.0  ;;  %v1617_v17 = vmul.f32 0.2, %v1377_v11  ;;  %v1380_v18 = vadd.f32 %v2572_v15, %v2494_v53  ;;  %v1371_v19 = vpop.f32.mrb[23].mxu1 }
 0x122   : > { %vm1551_vm11 = vcmp.ge.f32.partialorder %v1369_v14, 0.0  ;;  %v1615_v20 = vmul.f32 0.2, %v1369_v14  ;;  %v1372_v21 = vadd.f32 %v1371_v19, %v780_v56 }
 0x123   : > { %v1681_v22 = vsel %vm1553_vm10, %v1377_v11, %v1617_v17  ;;  %vm1554_vm12 = vcmp.ge.f32.partialorder %v1380_v18, 0.0  ;;  %v1618_v23 = vmul.f32 0.2, %v1380_v18 }
 0x124   : > { %v2349_v24 = vpack.c.bf16 %v1681_v22, %v1681_v22  ;;  %v1679_v25 = vsel %vm1551_vm11, %v1369_v14, %v1615_v20  ;;  %vm1552_vm13 = vcmp.ge.f32.partialorder %v1372_v21, 0.0  ;;  %v1616_v26 = vmul.f32 0.2, %v1372_v21 }
 0x125   : > { %v2347_v27 = vpack.c.bf16 %v1679_v25, %v1679_v25  ;;  %v1682_v28 = vsel %vm1554_vm12, %v1380_v18, %v1618_v23  ;;  %v2501_v29 = vpop.f32.mrb[32].mxu0 }
 0x126   : > { %2002 = vst.msk [vmem:[%s2992_s22 + $0x68] sm:$0xf] %vm1975_vm6, %v2349_v24  ;;  %v2350_v30 = vpack.c.bf16 %v1682_v28, %v1682_v28  ;;  %v1680_v31 = vsel %vm1552_vm13, %v1372_v21, %v1616_v26  ;;  %v2575_v32 = vpop.f32.mrb[24].mxu1  ;;  %v809_v33 = vpop.f32.mrb[33].mxu0 }
 0x127   : > { %2000 = vst.msk [vmem:[%s2992_s22 + $0x60] sm:$0xf] %vm1975_vm6, %v2347_v27  ;;  %v2348_v34 = vpack.c.bf16 %v1680_v31, %v1680_v31  ;;  %v1393_v35 = vadd.f32 %v2575_v32, %v2497_v5  ;;  %v1384_v36 = vpop.f32.mrb[25].mxu1  ;;  %v2502_v37 = vpop.f32.mrb[34].mxu0 }
 0x128   : > { %2003 = vst.msk [vmem:[%s2992_s22 + $0x6c] sm:$0xf] %vm1975_vm6, %v2350_v30  ;;  %v1385_v38 = vadd.f32 %v1384_v36, %v793_v9  ;;  %v2576_v39 = vpop.f32.mrb[26].mxu1  ;;  %v812_v40 = vpop.f32.mrb[35].mxu0 }
 0x129   : > { %2001 = vst.msk [vmem:[%s2992_s22 + $0x64] sm:$0xf] %vm1975_vm6, %v2348_v34  ;;  %vm1557_vm14 = vcmp.ge.f32.partialorder %v1393_v35, 0.0  ;;  %v1621_v41 = vmul.f32 0.2, %v1393_v35  ;;  %v1396_v42 = vadd.f32 %v2576_v39, %v2498_v13  ;;  %v1387_v43 = vpop.f32.mrb[27].mxu1 }
 0x12a   : > { %vm1555_vm15 = vcmp.ge.f32.partialorder %v1385_v38, 0.0  ;;  %v1619_v44 = vmul.f32 0.2, %v1385_v38  ;;  %v1388_v45 = vadd.f32 %v1387_v43, %v796_v16 }
 0x12b   : > { %v1685_v46 = vsel %vm1557_vm14, %v1393_v35, %v1621_v41  ;;  %vm1558_vm0 = vcmp.ge.f32.partialorder %v1396_v42, 0.0  ;;  %v1622_v47 = vmul.f32 0.2, %v1396_v42 }
 0x12c   : > { %v2353_v48 = vpack.c.bf16 %v1685_v46, %v1685_v46  ;;  %v1683_v49 = vsel %vm1555_vm15, %v1385_v38, %v1619_v44  ;;  %vm1556_vm1 = vcmp.ge.f32.partialorder %v1388_v45, 0.0  ;;  %v1620_v50 = vmul.f32 0.2, %v1388_v45 }
 0x12d   : > { %v2351_v51 = vpack.c.bf16 %v1683_v49, %v1683_v49  ;;  %v1686_v52 = vsel %vm1558_vm0, %v1396_v42, %v1622_v47  ;;  %v2505_v53 = vpop.f32.mrb[36].mxu0 }
 0x12e   : > { %2006 = vst.msk [vmem:[%s2992_s22 + $0x78] sm:$0xf] %vm1975_vm6, %v2353_v48  ;;  %v2354_v54 = vpack.c.bf16 %v1686_v52, %v1686_v52  ;;  %v1684_v55 = vsel %vm1556_vm1, %v1388_v45, %v1620_v50  ;;  %v2579_v56 = vpop.f32.mrb[28].mxu1  ;;  %v825_v57 = vpop.f32.mrb[37].mxu0 }
 0x12f   : > { %2004 = vst.msk [vmem:[%s2992_s22 + $0x70] sm:$0xf] %vm1975_vm6, %v2351_v51  ;;  %v2352_v58 = vpack.c.bf16 %v1684_v55, %v1684_v55  ;;  %v1409_v59 = vadd.f32 %v2579_v56, %v2501_v29  ;;  %v1400_v60 = vpop.f32.mrb[29].mxu1  ;;  %v2506_v61 = vpop.f32.mrb[38].mxu0 }
 0x130   : > { %2007 = vst.msk [vmem:[%s2992_s22 + $0x7c] sm:$0xf] %vm1975_vm6, %v2354_v54  ;;  %v1401_v62 = vadd.f32 %v1400_v60, %v809_v33  ;;  %v2580_v63 = vpop.f32.mrb[30].mxu1  ;;  %v828_v0 = vpop.f32.mrb[39].mxu0 }
 0x131   : > { %2005 = vst.msk [vmem:[%s2992_s22 + $0x74] sm:$0xf] %vm1975_vm6, %v2352_v58  ;;  %vm1561_vm2 = vcmp.ge.f32.partialorder %v1409_v59, 0.0  ;;  %v1625_v1 = vmul.f32 0.2, %v1409_v59  ;;  %v1412_v2 = vadd.f32 %v2580_v63, %v2502_v37  ;;  %v1403_v3 = vpop.f32.mrb[31].mxu1 }
 0x132   : > { %vm1559_vm3 = vcmp.ge.f32.partialorder %v1401_v62, 0.0  ;;  %v1623_v4 = vmul.f32 0.2, %v1401_v62  ;;  %v1404_v5 = vadd.f32 %v1403_v3, %v812_v40 }
 0x133   : > { %v1689_v6 = vsel %vm1561_vm2, %v1409_v59, %v1625_v1  ;;  %vm1562_vm4 = vcmp.ge.f32.partialorder %v1412_v2, 0.0  ;;  %v1626_v7 = vmul.f32 0.2, %v1412_v2 }
 0x134   : > { %v2357_v8 = vpack.c.bf16 %v1689_v6, %v1689_v6  ;;  %v1687_v9 = vsel %vm1559_vm3, %v1401_v62, %v1623_v4  ;;  %vm1560_vm5 = vcmp.ge.f32.partialorder %v1404_v5, 0.0  ;;  %v1624_v10 = vmul.f32 0.2, %v1404_v5 }
 0x135   : > { %v2355_v11 = vpack.c.bf16 %v1687_v9, %v1687_v9  ;;  %v1690_v12 = vsel %vm1562_vm4, %v1412_v2, %v1626_v7  ;;  %v2509_v13 = vpop.f32.mrb[40].mxu0 }
 0x136   : > { %2010 = vst.msk [vmem:[%s2992_s22 + $0x88] sm:$0xf] %vm1975_vm6, %v2357_v8  ;;  %v2358_v14 = vpack.c.bf16 %v1690_v12, %v1690_v12  ;;  %v1688_v15 = vsel %vm1560_vm5, %v1404_v5, %v1624_v10  ;;  %v2583_v16 = vpop.f32.mrb[32].mxu1  ;;  %v841_v17 = vpop.f32.mrb[41].mxu0 }
 0x137   : > { %2008 = vst.msk [vmem:[%s2992_s22 + $0x80] sm:$0xf] %vm1975_vm6, %v2355_v11  ;;  %v2356_v18 = vpack.c.bf16 %v1688_v15, %v1688_v15  ;;  %v1425_v19 = vadd.f32 %v2583_v16, %v2505_v53  ;;  %v1416_v20 = vpop.f32.mrb[33].mxu1  ;;  %v2510_v21 = vpop.f32.mrb[42].mxu0 }
 0x138   : > { %2011 = vst.msk [vmem:[%s2992_s22 + $0x8c] sm:$0xf] %vm1975_vm6, %v2358_v14  ;;  %v1417_v22 = vadd.f32 %v1416_v20, %v825_v57  ;;  %v2584_v23 = vpop.f32.mrb[34].mxu1  ;;  %v844_v24 = vpop.f32.mrb[43].mxu0 }
 0x139   : > { %2009 = vst.msk [vmem:[%s2992_s22 + $0x84] sm:$0xf] %vm1975_vm6, %v2356_v18  ;;  %vm1565_vm7 = vcmp.ge.f32.partialorder %v1425_v19, 0.0  ;;  %v1629_v25 = vmul.f32 0.2, %v1425_v19  ;;  %v1428_v26 = vadd.f32 %v2584_v23, %v2506_v61  ;;  %v1419_v27 = vpop.f32.mrb[35].mxu1 }
 0x13a   : > { %vm1563_vm8 = vcmp.ge.f32.partialorder %v1417_v22, 0.0  ;;  %v1627_v28 = vmul.f32 0.2, %v1417_v22  ;;  %v1420_v29 = vadd.f32 %v1419_v27, %v828_v0 }
 0x13b   : > { %v1693_v30 = vsel %vm1565_vm7, %v1425_v19, %v1629_v25  ;;  %vm1566_vm9 = vcmp.ge.f32.partialorder %v1428_v26, 0.0  ;;  %v1630_v31 = vmul.f32 0.2, %v1428_v26 }
 0x13c   : > { %v2361_v32 = vpack.c.bf16 %v1693_v30, %v1693_v30  ;;  %v1691_v33 = vsel %vm1563_vm8, %v1417_v22, %v1627_v28  ;;  %vm1564_vm10 = vcmp.ge.f32.partialorder %v1420_v29, 0.0  ;;  %v1628_v34 = vmul.f32 0.2, %v1420_v29 }
 0x13d   : > { %v2359_v35 = vpack.c.bf16 %v1691_v33, %v1691_v33  ;;  %v1694_v36 = vsel %vm1566_vm9, %v1428_v26, %v1630_v31  ;;  %v2513_v37 = vpop.f32.mrb[44].mxu0 }
 0x13e   : > { %2014 = vst.msk [vmem:[%s2992_s22 + $0x98] sm:$0xf] %vm1975_vm6, %v2361_v32  ;;  %v2362_v38 = vpack.c.bf16 %v1694_v36, %v1694_v36  ;;  %v1692_v39 = vsel %vm1564_vm10, %v1420_v29, %v1628_v34  ;;  %v2587_v40 = vpop.f32.mrb[36].mxu1  ;;  %v857_v41 = vpop.f32.mrb[45].mxu0 }
 0x13f   : > { %2012 = vst.msk [vmem:[%s2992_s22 + $0x90] sm:$0xf] %vm1975_vm6, %v2359_v35  ;;  %v2360_v42 = vpack.c.bf16 %v1692_v39, %v1692_v39  ;;  %v1441_v43 = vadd.f32 %v2587_v40, %v2509_v13  ;;  %v1432_v44 = vpop.f32.mrb[37].mxu1  ;;  %v2514_v45 = vpop.f32.mrb[46].mxu0 }
 0x140   : > { %2015 = vst.msk [vmem:[%s2992_s22 + $0x9c] sm:$0xf] %vm1975_vm6, %v2362_v38  ;;  %v1433_v46 = vadd.f32 %v1432_v44, %v841_v17  ;;  %v2588_v47 = vpop.f32.mrb[38].mxu1  ;;  %v860_v48 = vpop.f32.mrb[47].mxu0 }
 0x141   : > { %2013 = vst.msk [vmem:[%s2992_s22 + $0x94] sm:$0xf] %vm1975_vm6, %v2360_v42  ;;  %vm1569_vm11 = vcmp.ge.f32.partialorder %v1441_v43, 0.0  ;;  %v1633_v49 = vmul.f32 0.2, %v1441_v43  ;;  %v1444_v50 = vadd.f32 %v2588_v47, %v2510_v21  ;;  %v1435_v51 = vpop.f32.mrb[39].mxu1 }
 0x142   : > { %vm1567_vm12 = vcmp.ge.f32.partialorder %v1433_v46, 0.0  ;;  %v1631_v52 = vmul.f32 0.2, %v1433_v46  ;;  %v1436_v53 = vadd.f32 %v1435_v51, %v844_v24 }
 0x143   : > { %v1697_v54 = vsel %vm1569_vm11, %v1441_v43, %v1633_v49  ;;  %vm1570_vm13 = vcmp.ge.f32.partialorder %v1444_v50, 0.0  ;;  %v1634_v55 = vmul.f32 0.2, %v1444_v50 }
 0x144   : > { %v2365_v56 = vpack.c.bf16 %v1697_v54, %v1697_v54  ;;  %v1695_v57 = vsel %vm1567_vm12, %v1433_v46, %v1631_v52  ;;  %vm1568_vm14 = vcmp.ge.f32.partialorder %v1436_v53, 0.0  ;;  %v1632_v58 = vmul.f32 0.2, %v1436_v53 }
 0x145   : > { %v2363_v59 = vpack.c.bf16 %v1695_v57, %v1695_v57  ;;  %v1698_v60 = vsel %vm1570_vm13, %v1444_v50, %v1634_v55  ;;  %v2517_v61 = vpop.f32.mrb[48].mxu0 }
 0x146   : > { %2018 = vst.msk [vmem:[%s2992_s22 + $0xa8] sm:$0xf] %vm1975_vm6, %v2365_v56  ;;  %v2366_v62 = vpack.c.bf16 %v1698_v60, %v1698_v60  ;;  %v1696_v63 = vsel %vm1568_vm14, %v1436_v53, %v1632_v58  ;;  %v2591_v0 = vpop.f32.mrb[40].mxu1  ;;  %v873_v1 = vpop.f32.mrb[49].mxu0 }
 0x147   : > { %2016 = vst.msk [vmem:[%s2992_s22 + $0xa0] sm:$0xf] %vm1975_vm6, %v2363_v59  ;;  %v2364_v2 = vpack.c.bf16 %v1696_v63, %v1696_v63  ;;  %v1457_v3 = vadd.f32 %v2591_v0, %v2513_v37  ;;  %v1448_v4 = vpop.f32.mrb[41].mxu1  ;;  %v2518_v5 = vpop.f32.mrb[50].mxu0 }
 0x148   : > { %2019 = vst.msk [vmem:[%s2992_s22 + $0xac] sm:$0xf] %vm1975_vm6, %v2366_v62  ;;  %v1449_v6 = vadd.f32 %v1448_v4, %v857_v41  ;;  %v2592_v7 = vpop.f32.mrb[42].mxu1  ;;  %v876_v8 = vpop.f32.mrb[51].mxu0 }
 0x149   : > { %2017 = vst.msk [vmem:[%s2992_s22 + $0xa4] sm:$0xf] %vm1975_vm6, %v2364_v2  ;;  %vm1573_vm15 = vcmp.ge.f32.partialorder %v1457_v3, 0.0  ;;  %v1637_v9 = vmul.f32 0.2, %v1457_v3  ;;  %v1460_v10 = vadd.f32 %v2592_v7, %v2514_v45  ;;  %v1451_v11 = vpop.f32.mrb[43].mxu1 }
 0x14a   : > { %vm1571_vm0 = vcmp.ge.f32.partialorder %v1449_v6, 0.0  ;;  %v1635_v12 = vmul.f32 0.2, %v1449_v6  ;;  %v1452_v13 = vadd.f32 %v1451_v11, %v860_v48 }
 0x14b   : > { %v1701_v14 = vsel %vm1573_vm15, %v1457_v3, %v1637_v9  ;;  %vm1574_vm1 = vcmp.ge.f32.partialorder %v1460_v10, 0.0  ;;  %v1638_v15 = vmul.f32 0.2, %v1460_v10 }
 0x14c   : > { %v2369_v16 = vpack.c.bf16 %v1701_v14, %v1701_v14  ;;  %v1699_v17 = vsel %vm1571_vm0, %v1449_v6, %v1635_v12  ;;  %vm1572_vm2 = vcmp.ge.f32.partialorder %v1452_v13, 0.0  ;;  %v1636_v18 = vmul.f32 0.2, %v1452_v13 }
 0x14d   : > { %v2367_v19 = vpack.c.bf16 %v1699_v17, %v1699_v17  ;;  %v1702_v20 = vsel %vm1574_vm1, %v1460_v10, %v1638_v15  ;;  %v2521_v21 = vpop.f32.mrb[52].mxu0 }
 0x14e   : > { %2022 = vst.msk [vmem:[%s2992_s22 + $0xb8] sm:$0xf] %vm1975_vm6, %v2369_v16  ;;  %v2370_v22 = vpack.c.bf16 %v1702_v20, %v1702_v20  ;;  %v1700_v23 = vsel %vm1572_vm2, %v1452_v13, %v1636_v18  ;;  %v2595_v24 = vpop.f32.mrb[44].mxu1  ;;  %v889_v25 = vpop.f32.mrb[53].mxu0 }
 0x14f   : > { %2020 = vst.msk [vmem:[%s2992_s22 + $0xb0] sm:$0xf] %vm1975_vm6, %v2367_v19  ;;  %v2368_v26 = vpack.c.bf16 %v1700_v23, %v1700_v23  ;;  %v1473_v27 = vadd.f32 %v2595_v24, %v2517_v61  ;;  %v1464_v28 = vpop.f32.mrb[45].mxu1  ;;  %v2522_v29 = vpop.f32.mrb[54].mxu0 }
 0x150   : > { %2023 = vst.msk [vmem:[%s2992_s22 + $0xbc] sm:$0xf] %vm1975_vm6, %v2370_v22  ;;  %v1465_v30 = vadd.f32 %v1464_v28, %v873_v1  ;;  %v2596_v31 = vpop.f32.mrb[46].mxu1  ;;  %v892_v32 = vpop.f32.mrb[55].mxu0 }
 0x151   : > { %2021 = vst.msk [vmem:[%s2992_s22 + $0xb4] sm:$0xf] %vm1975_vm6, %v2368_v26  ;;  %vm1577_vm3 = vcmp.ge.f32.partialorder %v1473_v27, 0.0  ;;  %v1641_v33 = vmul.f32 0.2, %v1473_v27  ;;  %v1476_v34 = vadd.f32 %v2596_v31, %v2518_v5  ;;  %v1467_v35 = vpop.f32.mrb[47].mxu1 }
 0x152   : > { %vm1575_vm4 = vcmp.ge.f32.partialorder %v1465_v30, 0.0  ;;  %v1639_v36 = vmul.f32 0.2, %v1465_v30  ;;  %v1468_v37 = vadd.f32 %v1467_v35, %v876_v8 }
 0x153   : > { %v1705_v38 = vsel %vm1577_vm3, %v1473_v27, %v1641_v33  ;;  %vm1578_vm5 = vcmp.ge.f32.partialorder %v1476_v34, 0.0  ;;  %v1642_v39 = vmul.f32 0.2, %v1476_v34 }
 0x154   : > { %v2373_v40 = vpack.c.bf16 %v1705_v38, %v1705_v38  ;;  %v1703_v41 = vsel %vm1575_vm4, %v1465_v30, %v1639_v36  ;;  %vm1576_vm7 = vcmp.ge.f32.partialorder %v1468_v37, 0.0  ;;  %v1640_v42 = vmul.f32 0.2, %v1468_v37 }
 0x155   : > { %v2371_v43 = vpack.c.bf16 %v1703_v41, %v1703_v41  ;;  %v1706_v44 = vsel %vm1578_vm5, %v1476_v34, %v1642_v39  ;;  %v2525_v45 = vpop.f32.mrb[56].mxu0 }
 0x156   : > { %2026 = vst.msk [vmem:[%s2992_s22 + $0xc8] sm:$0xf] %vm1975_vm6, %v2373_v40  ;;  %v2374_v46 = vpack.c.bf16 %v1706_v44, %v1706_v44  ;;  %v1704_v47 = vsel %vm1576_vm7, %v1468_v37, %v1640_v42  ;;  %v2599_v48 = vpop.f32.mrb[48].mxu1  ;;  %v905_v49 = vpop.f32.mrb[57].mxu0 }
 0x157   : > { %2024 = vst.msk [vmem:[%s2992_s22 + $0xc0] sm:$0xf] %vm1975_vm6, %v2371_v43  ;;  %v2372_v50 = vpack.c.bf16 %v1704_v47, %v1704_v47  ;;  %v1489_v51 = vadd.f32 %v2599_v48, %v2521_v21  ;;  %v1480_v52 = vpop.f32.mrb[49].mxu1  ;;  %v2526_v53 = vpop.f32.mrb[58].mxu0 }
 0x158   : > { %2027 = vst.msk [vmem:[%s2992_s22 + $0xcc] sm:$0xf] %vm1975_vm6, %v2374_v46  ;;  %v1481_v54 = vadd.f32 %v1480_v52, %v889_v25  ;;  %v2600_v55 = vpop.f32.mrb[50].mxu1  ;;  %v908_v56 = vpop.f32.mrb[59].mxu0 }
 0x159   : > { %2025 = vst.msk [vmem:[%s2992_s22 + $0xc4] sm:$0xf] %vm1975_vm6, %v2372_v50  ;;  %vm1581_vm8 = vcmp.ge.f32.partialorder %v1489_v51, 0.0  ;;  %v1645_v57 = vmul.f32 0.2, %v1489_v51  ;;  %v1492_v58 = vadd.f32 %v2600_v55, %v2522_v29  ;;  %v1483_v59 = vpop.f32.mrb[51].mxu1 }
 0x15a   : > { %vm1579_vm9 = vcmp.ge.f32.partialorder %v1481_v54, 0.0  ;;  %v1643_v60 = vmul.f32 0.2, %v1481_v54  ;;  %v1484_v61 = vadd.f32 %v1483_v59, %v892_v32 }
 0x15b   : > { %v1709_v62 = vsel %vm1581_vm8, %v1489_v51, %v1645_v57  ;;  %vm1582_vm10 = vcmp.ge.f32.partialorder %v1492_v58, 0.0  ;;  %v1646_v63 = vmul.f32 0.2, %v1492_v58 }
 0x15c   : > { %v2377_v0 = vpack.c.bf16 %v1709_v62, %v1709_v62  ;;  %v1707_v1 = vsel %vm1579_vm9, %v1481_v54, %v1643_v60  ;;  %vm1580_vm11 = vcmp.ge.f32.partialorder %v1484_v61, 0.0  ;;  %v1644_v2 = vmul.f32 0.2, %v1484_v61 }
 0x15d   : > { %v2375_v3 = vpack.c.bf16 %v1707_v1, %v1707_v1  ;;  %v1710_v4 = vsel %vm1582_vm10, %v1492_v58, %v1646_v63  ;;  %v2529_v5 = vpop.f32.mrb[60].mxu0 }
 0x15e   : > { %2030 = vst.msk [vmem:[%s2992_s22 + $0xd8] sm:$0xf] %vm1975_vm6, %v2377_v0  ;;  %v2378_v6 = vpack.c.bf16 %v1710_v4, %v1710_v4  ;;  %v1708_v7 = vsel %vm1580_vm11, %v1484_v61, %v1644_v2  ;;  %v2603_v8 = vpop.f32.mrb[52].mxu1  ;;  %v921_v9 = vpop.f32.mrb[61].mxu0 }
 0x15f   : > { %2028 = vst.msk [vmem:[%s2992_s22 + $0xd0] sm:$0xf] %vm1975_vm6, %v2375_v3  ;;  %v2376_v10 = vpack.c.bf16 %v1708_v7, %v1708_v7  ;;  %v1505_v11 = vadd.f32 %v2603_v8, %v2525_v45  ;;  %v1496_v12 = vpop.f32.mrb[53].mxu1  ;;  %v2530_v13 = vpop.f32.mrb[62].mxu0 }
 0x160   : > { %2031 = vst.msk [vmem:[%s2992_s22 + $0xdc] sm:$0xf] %vm1975_vm6, %v2378_v6  ;;  %v1497_v14 = vadd.f32 %v1496_v12, %v905_v49  ;;  %v2604_v15 = vpop.f32.mrb[54].mxu1  ;;  %v924_v16 = vpop.f32.mrb[63].mxu0 }
 0x161   : > { %2029 = vst.msk [vmem:[%s2992_s22 + $0xd4] sm:$0xf] %vm1975_vm6, %v2376_v10  ;;  %vm1585_vm12 = vcmp.ge.f32.partialorder %v1505_v11, 0.0  ;;  %v1649_v17 = vmul.f32 0.2, %v1505_v11  ;;  %v1508_v18 = vadd.f32 %v2604_v15, %v2526_v53  ;;  %v1499_v19 = vpop.f32.mrb[55].mxu1 }
 0x162   : > { %vm1583_vm13 = vcmp.ge.f32.partialorder %v1497_v14, 0.0  ;;  %v1647_v20 = vmul.f32 0.2, %v1497_v14  ;;  %v1500_v21 = vadd.f32 %v1499_v19, %v908_v56 }
 0x163   : > { %v1713_v22 = vsel %vm1585_vm12, %v1505_v11, %v1649_v17  ;;  %vm1586_vm14 = vcmp.ge.f32.partialorder %v1508_v18, 0.0  ;;  %v1650_v23 = vmul.f32 0.2, %v1508_v18 }
 0x164   : > { %v2381_v24 = vpack.c.bf16 %v1713_v22, %v1713_v22  ;;  %v1711_v25 = vsel %vm1583_vm13, %v1497_v14, %v1647_v20  ;;  %vm1584_vm15 = vcmp.ge.f32.partialorder %v1500_v21, 0.0  ;;  %v1648_v26 = vmul.f32 0.2, %v1500_v21 }
 0x165   : > { %v2379_v27 = vpack.c.bf16 %v1711_v25, %v1711_v25  ;;  %v1714_v28 = vsel %vm1586_vm14, %v1508_v18, %v1650_v23  ;;  %v2547_v29 = vpop.f32.mrb[0].mxu0 }
 0x166   : > { %2034 = vst.msk [vmem:[%s2992_s22 + $0xe8] sm:$0xf] %vm1975_vm6, %v2381_v24  ;;  %v2382_v30 = vpack.c.bf16 %v1714_v28, %v1714_v28  ;;  %v1712_v31 = vsel %vm1584_vm15, %v1500_v21, %v1648_v26  ;;  %vm1529_vm0 = vcmp.ge.f32.partialorder %v2547_v29, 0.0  ;;  %v1593_v32 = vmul.f32 0.2, %v2547_v29  ;;  %v2607_v33 = vpop.f32.mrb[56].mxu1 }
 0x167   : > { %v1272_v34 = vpop.f32.mrb[1].mxu0  ;;  %2032 = vst.msk [vmem:[%s2992_s22 + $0xe0] sm:$0xf] %vm1975_vm6, %v2379_v27  ;;  %v2380_v35 = vpack.c.bf16 %v1712_v31, %v1712_v31  ;;  %v1521_v36 = vadd.f32 %v2607_v33, %v2529_v5  ;;  %v1512_v38 = vpop.f32.mrb[57].mxu1 }
 0x168   : > { %vm1527_vm1 = vcmp.ge.f32.partialorder %v1272_v34, 0.0  ;;  %v1591_v37 = vmul.f32 0.2, %v1272_v34  ;;  %v2548_v39 = vpop.f32.mrb[2].mxu0  ;;  %2035 = vst.msk [vmem:[%s2992_s22 + $0xec] sm:$0xf] %vm1975_vm6, %v2382_v30  ;;  %v1657_v40 = vsel %vm1529_vm0, %v2547_v29, %v1593_v32  ;;  %v1513_v41 = vadd.f32 %v1512_v38, %v921_v9 }
 0x169   : > { %vm1530_vm2 = vcmp.ge.f32.partialorder %v2548_v39, 0.0  ;;  %v1594_v42 = vmul.f32 0.2, %v2548_v39  ;;  %v2608_v43 = vpop.f32.mrb[58].mxu1  ;;  %v1275_v44 = vpop.f32.mrb[3].mxu0  ;;  %v2325_v45 = vpack.c.bf16 %v1657_v40, %v1657_v40  ;;  %vm1589_vm3 = vcmp.ge.f32.partialorder %v1521_v36, 0.0 }
 0x16a   : > { %2033 = vst.msk [vmem:[%s2992_s22 + $0xe4] sm:$0xf] %vm1975_vm6, %v2380_v35  ;;  %v1653_v46 = vmul.f32 0.2, %v1521_v36  ;;  %v1655_v47 = vsel %vm1527_vm1, %v1272_v34, %v1591_v37  ;;  %v1515_v48 = vpop.f32.mrb[59].mxu1  ;;  %vm1587_vm4 = vcmp.ge.f32.partialorder %v1513_v41, 0.0  ;;  %v1524_v54 = vadd.f32 %v2608_v43, %v2530_v13 }
 0x16b   : > { %v2323_v49 = vpack.c.bf16 %v1655_v47, %v1655_v47  ;;  %v1651_v50 = vmul.f32 0.2, %v1513_v41  ;;  %v1658_v51 = vsel %vm1530_vm2, %v2548_v39, %v1594_v42  ;;  %1978 = vst.msk [vmem:[%s2992_s22 + $0x8] sm:$0xf] %vm1975_vm6, %v2325_v45  ;;  %vm1528_vm5 = vcmp.ge.f32.partialorder %v1275_v44, 0.0 }
 0x16c   : > { %v1717_v52 = vsel %vm1589_vm3, %v1521_v36, %v1653_v46  ;;  %v2326_v53 = vpack.c.bf16 %v1658_v51, %v1658_v51  ;;  %v1592_v57 = vmul.f32 0.2, %v1275_v44  ;;  %v1516_v58 = vadd.f32 %v1515_v48, %v924_v16 }
 0x16d   : > { %v2385_v55 = vpack.c.bf16 %v1717_v52, %v1717_v52  ;;  %1976 = vst.msk [vmem:[%s2992_s22] sm:$0xf] %vm1975_vm6, %v2323_v49  ;;  %v1715_v56 = vsel %vm1587_vm4, %v1513_v41, %v1651_v50  ;;  %vm1590_vm7 = vcmp.ge.f32.partialorder %v1524_v54, 0.0  ;;  %v1654_v60 = vmul.f32 0.2, %v1524_v54 }
 0x16e   : > { %v2383_v59 = vpack.c.bf16 %v1715_v56, %v1715_v56  ;;  %1979 = vst.msk [vmem:[%s2992_s22 + $0xc] sm:$0xf] %vm1975_vm6, %v2326_v53  ;;  %v1656_v61 = vsel %vm1528_vm5, %v1275_v44, %v1592_v57  ;;  %vm1588_vm8 = vcmp.ge.f32.partialorder %v1516_v58, 0.0  ;;  %v1652_v62 = vmul.f32 0.2, %v1516_v58 }
 0x16f   : > { %2038 = vst.msk [vmem:[%s2992_s22 + $0xf8] sm:$0xf] %vm1975_vm6, %v2385_v55  ;;  %v1718_v63 = vsel %vm1590_vm7, %v1524_v54, %v1654_v60  ;;  %v2324_v0 = vpack.c.bf16 %v1656_v61, %v1656_v61 }
 0x170   : > { %2036 = vst.msk [vmem:[%s2992_s22 + $0xf0] sm:$0xf] %vm1975_vm6, %v2383_v59  ;;  %v2386_v1 = vpack.c.bf16 %v1718_v63, %v1718_v63  ;;  %v1716_v2 = vsel %vm1588_vm8, %v1516_v58, %v1652_v62 }
 0x171   : > { %1977 = vst.msk [vmem:[%s2992_s22 + $0x4] sm:$0xf] %vm1975_vm6, %v2324_v0  ;;  %v2384_v3 = vpack.c.bf16 %v1716_v2, %v1716_v2 }
 0x172   : > { %2039 = vst.msk [vmem:[%s2992_s22 + $0xfc] sm:$0xf] %vm1975_vm6, %v2386_v1 }
 0x173   : > { %2037 = vst.msk [vmem:[%s2992_s22 + $0xf4] sm:$0xf] %vm1975_vm6, %v2384_v3 }
 0x174 PF: > { %s14_s15 = sadd.s32 1, %s2778_s15  }
 0x175   : > { %p11_p4 = scmp.ge.s32.totalorder %s14_s15, 6  }
 0x177   :  { %13 = sbr.rel (!%p11_p4) target bundleno = 1 (0x1), region = 69 }

// kernel: discriminator_forward.5
= control target key start
LH: loop header
LB: loop body
LE: loop exit
PB: predicated region body
PF: predicated region fallthrough
CT: control target
= control target key end

     0   :  { %vm320_vm0 = vcmask 261120   ;;  %v1178_v42 = vmov 0.0|0.0   ;;  %vm1179_vm1 = vmmov 0   ;;  %v1180_v63 = vmov 0.0   ;;  %s1648_s1 = inlined_call_operand.vmem [shape: bf16[288,32], index: 1, kind: input, shape index: {}]   ;;  %s1649_s0 = inlined_call_operand.vmem [shape: bf16[128,288], index: 0, kind: input, shape index: {}]   ;;  %s1650_s2 = inlined_call_operand.vmem [shape: f32[1,32], index: 2, kind: input, shape index: {}]   ;;  %s1651_s3 = inlined_call_operand.vmem [shape: f32[1,32], index: 3, kind: input, shape index: {}]   ;;  %s1652_s4 = inlined_call_operand.vmem [shape: f32[128,32], index: 4, kind: input, shape index: {}]   ;;  %s1653_s5 = inlined_call_operand.vmem [shape: f32[2,128], index: 5, kind: input, shape index: {}]   ;;  %s1654_s6 = inlined_call_operand.vmem [shape: f32[2,1], index: 6, kind: output, shape index: {}]  }
   0x1   :  { %v1122_v0 = vld [vmem:[%s1648_s1 + $0x40] sm:$0xff]   ;;  %v1124_v2 = vld [vmem:[%s1648_s1 + $0x48] sm:$0xff]   ;;  %v1126_v4 = vld [vmem:[%s1648_s1 + $0x50] sm:$0xff]  }
   0x2   :  { %v1123_v1 = vld [vmem:[%s1648_s1] sm:$0xff]   ;;  %933 = vmatprep.subr.bf16.mxu0 %v1122_v0  ;;  %1103 = vmatprep.subr.bf16.mxu1 %v1122_v0  ;;  %v1125_v3 = vld [vmem:[%s1648_s1 + $0x8] sm:$0xff]   ;;  %v1127_v5 = vld [vmem:[%s1648_s1 + $0x10] sm:$0xff]  }
   0x3   :  { %934 = vmatpush3.bf16.msra.mxu0 %v1123_v1  ;;  %1111 = vmatpush3.bf16.msra.mxu1 %v1123_v1  ;;  %v1128_v6 = vld [vmem:[%s1648_s1 + $0x58] sm:$0xff]   ;;  %v1130_v8 = vld [vmem:[%s1648_s1 + $0x60] sm:$0xff]   ;;  %v1132_v10 = vld [vmem:[%s1648_s1 + $0x68] sm:$0xff]  }
   0x4   :  { %935 = vmatprep.subr.bf16.mxu0 %v1124_v2  ;;  %1104 = vmatprep.subr.bf16.mxu1 %v1124_v2  ;;  %v1129_v7 = vld [vmem:[%s1648_s1 + $0x18] sm:$0xff]   ;;  %v1131_v9 = vld [vmem:[%s1648_s1 + $0x20] sm:$0xff]   ;;  %v1133_v13 = vld [vmem:[%s1648_s1 + $0x28] sm:$0xff]  }
   0x5   :  { %v1140_v11 = vld [vmem:[%s1649_s0 + $0x4] ss:$12 sps:$4 sm:$0xff]   ;;  %v1143_v12 = vld [vmem:[%s1649_s0 + $0xac] ss:$12 sps:$4 sm:$0xff]   ;;  %v1141_v20 = vld [vmem:[%s1649_s0 + $0xa8] ss:$12 sps:$4 sm:$0xff]  }
   0x6   :  { %v1134_v14 = vld [vmem:[%s1648_s1 + $0x70] sm:$0xff]   ;;  %377 = vmatprep.mubr.bf16.mxu0 %v1140_v11  ;;  %433 = vmatprep.mubr.bf16.mxu1 %v1143_v12  ;;  %v1136_v16 = vld [vmem:[%s1648_s1 + $0x78] sm:$0xff]   ;;  %v1144_v18 = vld [vmem:[%s1648_s1 + $0x80] sm:$0xff]  }
   0x7   :  { %936 = vmatpush3.bf16.msra.mxu0 %v1125_v3  ;;  %1112 = vmatpush3.bf16.msra.mxu1 %v1125_v3  ;;  %v1135_v15 = vld [vmem:[%s1648_s1 + $0x30] sm:$0xff]   ;;  %v1137_v17 = vld [vmem:[%s1648_s1 + $0x38] sm:$0xff]   ;;  %v1138_v19 = vld [vmem:[%s1649_s0] ss:$12 sps:$4 sm:$0xff]  }
   0x8   :  { %937 = vmatprep.subr.bf16.mxu0 %v1126_v4  ;;  %1105 = vmatprep.subr.bf16.mxu1 %v1126_v4  ;;  %v1146_v21 = vld [vmem:[%s1649_s0 + $0x1c] ss:$12 sps:$4 sm:$0xff]   ;;  %v1149_v24 = vld [vmem:[%s1649_s0 + $0x18] ss:$12 sps:$4 sm:$0xff]   ;;  %v1150_v25 = vld [vmem:[%s1649_s0 + $0x20] ss:$12 sps:$4 sm:$0xff]  }
   0x9   :  { %v1145_v22 = vld [vmem:[%s1648_s1 + $0x88] sm:$0xff]   ;;  %v1151_v26 = vld [vmem:[%s1649_s0 + $0x34] ss:$12 sps:$4 sm:$0xff]   ;;  %v1153_v27 = vld [vmem:[%s1649_s0 + $0x38] ss:$12 sps:$4 sm:$0xff]  }
   0xa   :  { %v1148_v23 = vld [vmem:[%s1649_s0 + $0x8] ss:$12 sps:$4 sm:$0xff]   ;;  %v1154_v28 = vld [vmem:[%s1649_s0 + $0x30] ss:$12 sps:$4 sm:$0xff]   ;;  %v1156_v30 = vld [vmem:[%s1649_s0 + $0x4c] ss:$12 sps:$4 sm:$0xff]  }
   0xb   :  { %938 = vmatpush3.bf16.msra.mxu0 %v1127_v5  ;;  %1113 = vmatpush3.bf16.msra.mxu1 %v1127_v5  ;;  %v1155_v29 = vld [vmem:[%s1649_s0 + $0x50] ss:$12 sps:$4 sm:$0xff]   ;;  %v1158_v31 = vld [vmem:[%s1649_s0 + $0x68] ss:$12 sps:$4 sm:$0xff]   ;;  %v1160_v33 = vld [vmem:[%s1649_s0 + $0x80] ss:$12 sps:$4 sm:$0xff]  }
   0xc   :  { %939 = vmatprep.subr.bf16.mxu0 %v1128_v6  ;;  %1106 = vmatprep.subr.bf16.mxu1 %v1128_v6  ;;  %v1159_v32 = vld [vmem:[%s1649_s0 + $0x48] ss:$12 sps:$4 sm:$0xff]   ;;  %v1161_v34 = vld [vmem:[%s1649_s0 + $0x64] ss:$12 sps:$4 sm:$0xff]   ;;  %v1164_v36 = vld [vmem:[%s1649_s0 + $0x60] ss:$12 sps:$4 sm:$0xff]  }
   0xd   :  { %v1163_v35 = vld [vmem:[%s1649_s0 + $0x98] ss:$12 sps:$4 sm:$0xff]   ;;  %v1165_v37 = vld [vmem:[%s1649_s0 + $0xb0] ss:$12 sps:$4 sm:$0xff]   ;;  %v1169_v40 = vld [vmem:[%s1649_s0 + $0x94] ss:$12 sps:$4 sm:$0xff]  }
   0xe   :  { %v1166_v38 = vld [vmem:[%s1649_s0 + $0x7c] ss:$12 sps:$4 sm:$0xff]   ;;  %v1168_v39 = vld [vmem:[%s1649_s0 + $0x78] ss:$12 sps:$4 sm:$0xff]  }
   0xf   :  { %940 = vmatpush3.bf16.msra.mxu0 %v1129_v7  ;;  %1114 = vmatpush3.bf16.msra.mxu1 %v1129_v7  ;;  %v1171_v41 = vld [vmem:[%s1649_s0 + $0x90] ss:$12 sps:$4 sm:$0xff]  }
  0x10   :  { %941 = vmatprep.subr.bf16.mxu0 %v1130_v8  ;;  %1107 = vmatprep.subr.bf16.mxu1 %v1130_v8 }
  0x13   :  { %942 = vmatpush3.bf16.msra.mxu0 %v1131_v9  ;;  %1115 = vmatpush3.bf16.msra.mxu1 %v1131_v9 }
  0x14   :  { %943 = vmatprep.subr.bf16.mxu0 %v1132_v10  ;;  %1108 = vmatprep.subr.bf16.mxu1 %v1132_v10 }
  0x17   :  { %944 = vmatpush3.bf16.msra.mxu0 %v1133_v13  ;;  %1116 = vmatpush3.bf16.msra.mxu1 %v1133_v13 }
  0x18   :  { %945 = vmatprep.subr.bf16.mxu0 %v1134_v14  ;;  %1109 = vmatprep.subr.bf16.mxu1 %v1134_v14 }
  0x1b   :  { %946 = vmatpush3.bf16.msra.mxu0 %v1135_v15  ;;  %1117 = vmatpush3.bf16.msra.mxu1 %v1135_v15 }
  0x1c   :  { %947 = vmatprep.subr.bf16.mxu0 %v1136_v16  ;;  %1110 = vmatprep.subr.bf16.mxu1 %v1136_v16 }
  0x1f   :  { %948 = vmatpush3.bf16.msra.mxu0 %v1137_v17  ;;  %1118 = vmatpush3.bf16.msra.mxu1 %v1137_v17 }
  0x20   :  { %1024 = vmatprep.subr.bf16.mxu1 %v1144_v18 }
  0x22   :  { %378 = vmatmul.mubr.bf16.vlgmr.msra.gmra.mrb[0].mxu0 %v1138_v19  ;;  %434 = vmatmul.mubr.bf16.vlgmr.msra.gmra.mrb[0].mxu1 %v1141_v20 }
  0x23   :  { %1025 = vmatpush3.bf16.msra.mxu1 %v1144_v18  ;;  %385 = vmatprep.mubr.bf16.mxu0 %v1146_v21 }
  0x24   :  { %1026 = vmatprep.subr.bf16.mxu1 %v1145_v22  ;;  %1028 = vmatprep.mubr.msk.bf16.mxu1 %vm320_vm0, %v1148_v23 }
  0x27   :  { %1027 = vmatpush3.bf16.msra.mxu1 %v1145_v22 }
  0x28   :  { %1079 = vmatprep.subr.bf16.mxu1 %v1178_v42 }
  0x2a   :  { %386 = vmatmul.mubr.bf16.gmra.mrb[4].mxu0 %v1149_v24  ;;  %1029 = vmatmul.mubr.msk.bf16.vlgmr.msra.gmra.mrb[4].mxu1 %vm320_vm0, %v1150_v25 }
  0x2b   :  { %393 = vmatprep.mubr.bf16.mxu0 %v1151_v26  ;;  %1032 = vmatprep.mubr.msk.bf16.mxu1 %vm320_vm0, %v1153_v27 }
  0x32   :  { %394 = vmatmul.mubr.bf16.gmra.mrb[8].mxu0 %v1154_v28  ;;  %1033 = vmatmul.mubr.msk.bf16.gmra.mrb[8].mxu1 %vm320_vm0, %v1155_v29 }
  0x33   :  { %401 = vmatprep.mubr.bf16.mxu0 %v1156_v30  ;;  %1036 = vmatprep.mubr.msk.bf16.mxu1 %vm320_vm0, %v1158_v31 }
  0x3a   :  { %402 = vmatmul.mubr.bf16.gmra.mrb[12].mxu0 %v1159_v32  ;;  %1037 = vmatmul.mubr.msk.bf16.gmra.mrb[12].mxu1 %vm320_vm0, %v1160_v33 }
  0x3b   :  { %409 = vmatprep.mubr.bf16.mxu0 %v1161_v34  ;;  %1040 = vmatprep.mubr.msk.bf16.mxu1 %vm320_vm0, %v1163_v35 }
  0x42   :  { %410 = vmatmul.mubr.bf16.gmra.mrb[16].mxu0 %v1164_v36  ;;  %1041 = vmatmul.mubr.msk.bf16.gmra.mrb[16].mxu1 %vm320_vm0, %v1165_v37 }
  0x43   :  { %417 = vmatprep.mubr.bf16.mxu0 %v1166_v38  ;;  %1076 = vmatprep.mubr.msk.f32.mxu1 %vm1179_vm1, %v1180_v63 }
  0x4a   :  { %418 = vmatmul.mubr.bf16.gmra.mrb[20].mxu0 %v1168_v39 }
  0x4b   :  { %425 = vmatprep.mubr.bf16.mxu0 %v1169_v40 }
  0x52   :  { %426 = vmatmul.mubr.bf16.gmra.mrb[24].mxu0 %v1171_v41 }
  0xf5   :  { %v949_v43 = vpop.f32.mrb[0].mxu0  ;;  %v991_v44 = vpop.f32.mrb[0].mxu1 }
  0xf6   :  { %v950_v45 = vpop.f32.mrb[1].mxu0  ;;  %v992_v46 = vpop.f32.mrb[1].mxu1 }
  0xf7   :  { %v951_v47 = vadd.f32 %v950_v45, %v949_v43  ;;  %v952_v48 = vpop.f32.mrb[2].mxu0  ;;  %v1351_v49 = vadd.f32 %v992_v46, %v991_v44  ;;  %v994_v50 = vpop.f32.mrb[2].mxu1 }
  0xf8   :  { %v953_v51 = vpop.f32.mrb[3].mxu0  ;;  %v995_v52 = vpop.f32.mrb[3].mxu1 }
  0xf9   :  { %v954_v53 = vadd.f32 %v953_v51, %v952_v48  ;;  %v1353_v54 = vadd.f32 %v995_v52, %v994_v50 }
  0xfd   :  { %v955_v55 = vpop.f32.mrb[4].mxu0  ;;  %v1030_v56 = vpop.f32.mrb[4].mxu1 }
  0xfe   :  { %v956_v57 = vpop.f32.mrb[5].mxu0  ;;  %v476_v58 = vpop.f32.mrb[5].mxu1 }
  0xff   :  { %v957_v59 = vadd.f32 %v956_v57, %v955_v55  ;;  %v1355_v60 = vadd.f32 %v951_v47, %v476_v58  ;;  %v958_v61 = vpop.f32.mrb[6].mxu0  ;;  %v1031_v62 = vpop.f32.mrb[6].mxu1 }
 0x100   :  { %v959_v0 = vpop.f32.mrb[7].mxu0  ;;  %v479_v1 = vpop.f32.mrb[7].mxu1 }
 0x101   :  { %v1357_v2 = vadd.f32 %v1030_v56, %v957_v59  ;;  %v960_v3 = vadd.f32 %v959_v0, %v958_v61  ;;  %v576_v4 = vmul.f32 %v1355_v60, %v1355_v60  ;;  %v1361_v5 = vadd.f32 %v954_v53, %v479_v1 }
 0x102   :  { %v539_v8 = vsel %vm320_vm0, %v1355_v60, 0.0 }
 0x103   :  { %v1363_v6 = vadd.f32 %v1031_v62, %v960_v3  ;;  %v578_v7 = vmul.f32 %v1357_v2, %v1357_v2  ;;  %v540_v9 = vsel %vm320_vm0, %v1361_v5, 0.0  ;;  %v577_v10 = vmul.f32 %v1361_v5, %v1361_v5 }
 0x104   :  { %v541_v11 = vadd.f32 %v540_v9, %v539_v8  ;;  %v542_v14 = vsel %vm320_vm0, %v1357_v2, 0.0  ;;  %v592_v15 = vsel %vm320_vm0, %v576_v4, 0.0 }
 0x105   :  { %v961_v12 = vpop.f32.mrb[8].mxu0  ;;  %v1034_v13 = vpop.f32.mrb[8].mxu1  ;;  %v579_v16 = vmul.f32 %v1363_v6, %v1363_v6  ;;  %v593_v17 = vsel %vm320_vm0, %v577_v10, 0.0  ;;  %v595_v25 = vsel %vm320_vm0, %v578_v7, 0.0  ;;  %v544_v26 = vsel %vm320_vm0, %v1363_v6, 0.0 }
 0x106   :  { %v962_v18 = vpop.f32.mrb[9].mxu0  ;;  %v492_v19 = vpop.f32.mrb[9].mxu1  ;;  %v543_v20 = vadd.f32 %v542_v14, %v541_v11  ;;  %v594_v21 = vadd.f32 %v593_v17, %v592_v15 }
 0x107   :  { %v963_v22 = vadd.f32 %v962_v18, %v961_v12  ;;  %v964_v23 = vpop.f32.mrb[10].mxu0  ;;  %v1035_v24 = vpop.f32.mrb[10].mxu1  ;;  %v597_v33 = vsel %vm320_vm0, %v579_v16, 0.0 }
 0x108   :  { %v965_v27 = vpop.f32.mrb[11].mxu0  ;;  %v495_v28 = vpop.f32.mrb[11].mxu1  ;;  %v596_v29 = vadd.f32 %v595_v25, %v594_v21  ;;  %v545_v32 = vadd.f32 %v544_v26, %v543_v20 }
 0x109   :  { %v966_v30 = vadd.f32 %v965_v27, %v964_v23  ;;  %v1382_v31 = vadd.f32 %v963_v22, %v492_v19 }
 0x10a   :  { %v598_v36 = vadd.f32 %v597_v33, %v596_v29 }
 0x10b   :  { %v546_v34 = vsel %vm320_vm0, %v1382_v31, 0.0  ;;  %v580_v35 = vmul.f32 %v1382_v31, %v1382_v31  ;;  %v1389_v37 = vadd.f32 %v966_v30, %v495_v28 }
 0x10c   :  { %v547_v38 = vadd.f32 %v546_v34, %v545_v32 }
 0x10d   :  { %v599_v39 = vsel %vm320_vm0, %v580_v35, 0.0  ;;  %v548_v40 = vsel %vm320_vm0, %v1389_v37, 0.0  ;;  %v581_v41 = vmul.f32 %v1389_v37, %v1389_v37  ;;  %v967_v43 = vpop.f32.mrb[12].mxu0  ;;  %v1038_v44 = vpop.f32.mrb[12].mxu1 }
 0x10e   :  { %v600_v45 = vadd.f32 %v599_v39, %v598_v36  ;;  %v549_v46 = vadd.f32 %v548_v40, %v547_v38  ;;  %v968_v47 = vpop.f32.mrb[13].mxu0  ;;  %v508_v48 = vpop.f32.mrb[13].mxu1 }
 0x10f   :  { %v601_v50 = vsel %vm320_vm0, %v581_v41, 0.0  ;;  %v969_v51 = vadd.f32 %v968_v47, %v967_v43  ;;  %v970_v52 = vpop.f32.mrb[14].mxu0  ;;  %v1039_v53 = vpop.f32.mrb[14].mxu1 }
 0x110   :  { %v602_v55 = vadd.f32 %v601_v50, %v600_v45  ;;  %v971_v56 = vpop.f32.mrb[15].mxu0  ;;  %v511_v57 = vpop.f32.mrb[15].mxu1 }
 0x111   :  { %v1397_v58 = vadd.f32 %v1034_v13, %v969_v51  ;;  %v972_v59 = vadd.f32 %v971_v56, %v970_v52 }
 0x113   :  { %v550_v61 = vsel %vm320_vm0, %v1397_v58, 0.0  ;;  %v582_v62 = vmul.f32 %v1397_v58, %v1397_v58  ;;  %v1403_v63 = vadd.f32 %v1035_v24, %v972_v59 }
 0x114   :  { %v551_v0 = vadd.f32 %v550_v61, %v549_v46 }
 0x115   :  { %v603_v1 = vsel %vm320_vm0, %v582_v62, 0.0  ;;  %v552_v3 = vsel %vm320_vm0, %v1403_v63, 0.0  ;;  %v583_v4 = vmul.f32 %v1403_v63, %v1403_v63  ;;  %v973_v7 = vpop.f32.mrb[16].mxu0  ;;  %v1042_v8 = vpop.f32.mrb[16].mxu1 }
 0x116   :  { %v604_v9 = vadd.f32 %v603_v1, %v602_v55  ;;  %v553_v10 = vadd.f32 %v552_v3, %v551_v0  ;;  %v1411_v11 = vadd.f32 %v1042_v8, %v1351_v49  ;;  %v974_v12 = vpop.f32.mrb[17].mxu0  ;;  %v524_v13 = vpop.f32.mrb[17].mxu1 }
 0x117   :  { %v605_v14 = vsel %vm320_vm0, %v583_v4, 0.0  ;;  %v975_v15 = vadd.f32 %v974_v12, %v973_v7  ;;  %v976_v16 = vpop.f32.mrb[18].mxu0  ;;  %v1043_v17 = vpop.f32.mrb[18].mxu1 }
 0x118   :  { %v606_v18 = vadd.f32 %v605_v14, %v604_v9  ;;  %v1415_v19 = vadd.f32 %v1043_v17, %v1353_v54  ;;  %v977_v20 = vpop.f32.mrb[19].mxu0  ;;  %v527_v21 = vpop.f32.mrb[19].mxu1  ;;  %v590_v9 = vmul.f32 %v1411_v11, %v1411_v11 }
 0x119   :  { %v1417_v22 = vadd.f32 %v975_v15, %v508_v48  ;;  %v978_v23 = vadd.f32 %v977_v20, %v976_v16  ;;  %v566_v16 = vsel %vm320_vm0, %v1411_v11, 0.0 }
 0x11a   :  { %v591_v17 = vmul.f32 %v1415_v19, %v1415_v19 }
 0x11b   :  { %v554_v49 = vsel %vm320_vm0, %v1417_v22, 0.0  ;;  %v584_v24 = vmul.f32 %v1417_v22, %v1417_v22  ;;  %v1423_v25 = vadd.f32 %v978_v23, %v511_v57  ;;  %v619_v23 = vsel %vm320_vm0, %v590_v9, 0.0 }
 0x11c   :  { %v555_v26 = vadd.f32 %v554_v49, %v553_v10  ;;  %v568_v49 = vsel %vm320_vm0, %v1415_v19, 0.0 }
 0x11d   :  { %v607_v27 = vsel %vm320_vm0, %v584_v24, 0.0  ;;  %v556_v54 = vsel %vm320_vm0, %v1423_v25, 0.0  ;;  %v585_v28 = vmul.f32 %v1423_v25, %v1423_v25  ;;  %v979_v29 = vpop.f32.mrb[20].mxu0 }
 0x11e   :  { %v608_v30 = vadd.f32 %v607_v27, %v606_v18  ;;  %v557_v32 = vadd.f32 %v556_v54, %v555_v26  ;;  %v980_v33 = vpop.f32.mrb[21].mxu0  ;;  %v621_v27 = vsel %vm320_vm0, %v591_v17, 0.0 }
 0x11f   :  { %v609_v34 = vsel %vm320_vm0, %v585_v28, 0.0  ;;  %v981_v35 = vadd.f32 %v980_v33, %v979_v29  ;;  %v982_v36 = vpop.f32.mrb[22].mxu0 }
 0x120   :  { %v610_v38 = vadd.f32 %v609_v34, %v608_v30  ;;  %v983_v39 = vpop.f32.mrb[23].mxu0 }
 0x121   :  { %v1431_v40 = vadd.f32 %v1038_v44, %v981_v35  ;;  %v984_v41 = vadd.f32 %v983_v39, %v982_v36 }
 0x123   :  { %v558_v43 = vsel %vm320_vm0, %v1431_v40, 0.0  ;;  %v586_v45 = vmul.f32 %v1431_v40, %v1431_v40  ;;  %v1437_v46 = vadd.f32 %v1039_v53, %v984_v41 }
 0x124   :  { %v559_v47 = vadd.f32 %v558_v43, %v557_v32 }
 0x125   :  { %v611_v48 = vsel %vm320_vm0, %v586_v45, 0.0  ;;  %v560_v50 = vsel %vm320_vm0, %v1437_v46, 0.0  ;;  %v587_v51 = vmul.f32 %v1437_v46, %v1437_v46  ;;  %v985_v44 = vpop.f32.mrb[24].mxu0 }
 0x126   :  { %v612_v52 = vadd.f32 %v611_v48, %v610_v38  ;;  %v561_v55 = vadd.f32 %v560_v50, %v559_v47  ;;  %v986_v56 = vpop.f32.mrb[25].mxu0 }
 0x127   :  { %v613_v57 = vsel %vm320_vm0, %v587_v51, 0.0  ;;  %v987_v59 = vadd.f32 %v986_v56, %v985_v44  ;;  %v988_v61 = vpop.f32.mrb[26].mxu0 }
 0x128   :  { %v614_v62 = vadd.f32 %v613_v57, %v612_v52  ;;  %v989_v53 = vpop.f32.mrb[27].mxu0 }
 0x129   :  { %v1445_v0 = vadd.f32 %v987_v59, %v524_v13  ;;  %v990_v1 = vadd.f32 %v989_v53, %v988_v61 }
 0x12b   :  { %v562_v3 = vsel %vm320_vm0, %v1445_v0, 0.0  ;;  %v588_v4 = vmul.f32 %v1445_v0, %v1445_v0  ;;  %v528_v7 = vadd.f32 %v990_v1, %v527_v21 }
 0x12c   :  { %v563_v8 = vadd.f32 %v562_v3, %v561_v55  ;;  %v1504_v3 = vld [vmem:[%s1650_s2] ss:$0 sm:$0xff] }
 0x12d   :  { %v615_v10 = vsel %vm320_vm0, %v588_v4, 0.0  ;;  %v564_v12 = vsel %vm320_vm0, %v528_v7, 0.0  ;;  %v589_v14 = vmul.f32 %v528_v7, %v528_v7 }
 0x12e   :  { %v616_v15 = vadd.f32 %v615_v10, %v614_v62  ;;  %v565_v13 = vadd.f32 %v564_v12, %v563_v8  ;;  %v1513_v10 = vld [vmem:[%s1651_s3] ss:$0 sm:$0xff] }
 0x12f   :  { %v617_v18 = vsel %vm320_vm0, %v589_v14, 0.0 }
 0x130   :  { %v567_v20 = vadd.f32 %v566_v16, %v565_v13  ;;  %v618_v21 = vadd.f32 %v617_v18, %v616_v15 }
 0x132   :  { %v569_v24 = vadd.f32 %v568_v49, %v567_v20  ;;  %v620_v26 = vadd.f32 %v619_v23, %v618_v21 }
 0x134   :  { %v570_v54 = vrot.slane %v569_v24, 4  ;;  %v622_v28 = vadd.f32 %v621_v27, %v620_v26 }
 0x136   :  { %v571_v29 = vadd.f32 %v570_v54, %v569_v24  ;;  %v623_v30 = vrot.slane %v622_v28, 4 }
 0x138   :  { %v572_v32 = vrot.slane %v571_v29, 2  ;;  %v624_v33 = vadd.f32 %v623_v30, %v622_v28  ;;  %v762_v28 = vld [vmem:[%s1652_s4] sm:$0xff]  ;;  %v763_v30 = vld [vmem:[%s1652_s4 + $0x8] sm:$0xff] }
 0x13a   :  { %v573_v34 = vadd.f32 %v572_v32, %v571_v29  ;;  %v625_v35 = vrot.slane %v624_v33, 2 }
 0x13c   :  { %v574_v36 = vrot.slane %v573_v34, 1  ;;  %v626_v38 = vadd.f32 %v625_v35, %v624_v33  ;;  %v764_v33 = vld [vmem:[%s1652_s4 + $0x10] sm:$0xff] }
 0x13e   :  { %v575_v39 = vadd.f32 %v574_v36, %v573_v34  ;;  %v627_v41 = vrot.slane %v626_v38, 1  ;;  %v765_v34 = vld [vmem:[%s1652_s4 + $0x18] sm:$0xff] }
 0x140   :  { %v628_v43 = vadd.f32 %v627_v41, %v626_v38  ;;  %v1464_v45 = vmul.f32 0.0078125, %v575_v39 }
 0x142   :  { %v630_v47 = vmul.f32 0.0078125, %v628_v43  ;;  %v631_v48 = vmul.f32 %v1464_v45, %v1464_v45  ;;  %v647_v50 = vsub.f32 %v528_v7, %v1464_v45  ;;  %v634_v51 = vsub.f32 %v1355_v60, %v1464_v45 }
 0x143   :  { %v635_v44 = vsub.f32 %v1361_v5, %v1464_v45  ;;  %v636_v52 = vsub.f32 %v1357_v2, %v1464_v45  ;;  %v637_v55 = vsub.f32 %v1363_v6, %v1464_v45  ;;  %v638_v56 = vsub.f32 %v1382_v31, %v1464_v45 }
 0x144   :  { %v632_v57 = vsub.f32 %v630_v47, %v631_v48  ;;  %v639_v59 = vsub.f32 %v1389_v37, %v1464_v45  ;;  %v640_v61 = vsub.f32 %v1397_v58, %v1464_v45  ;;  %v641_v60 = vsub.f32 %v1403_v63, %v1464_v45 }
 0x145   :  { %v642_v5 = vsub.f32 %v1417_v22, %v1464_v45  ;;  %v643_v2 = vsub.f32 %v1423_v25, %v1464_v45  ;;  %v644_v6 = vsub.f32 %v1431_v40, %v1464_v45  ;;  %v645_v31 = vsub.f32 %v1437_v46, %v1464_v45 }
 0x146   :  { %v633_v62 = vmax.f32 %v632_v57, 0.0  ;;  %v646_v37 = vsub.f32 %v1445_v0, %v1464_v45  ;;  %v648_v58 = vsub.f32 %v1411_v11, %v1464_v45  ;;  %v649_v63 = vsub.f32 %v1415_v19, %v1464_v45 }
 0x148   :  { %v650_v53 = vadd.f32 1e-05, %v633_v62  ;;  %v767_v62 = vld [vmem:[%s1652_s4 + $0x28] sm:$0xff] }
 0x14a   :  { %1172 = vrsqrt.f32 %v650_v53 }
 0x154   :  { %v1499_v1 = vpop.eup %1172 }
 0x155   :  { %v665_v4 = vmul.f32 %v1499_v1, %v647_v50  ;;  %v652_v7 = vmul.f32 %v1499_v1, %v634_v51  ;;  %v653_v8 = vmul.f32 %v1499_v1, %v635_v44  ;;  %v654_v9 = vmul.f32 %v1499_v1, %v636_v52 }
 0x156   :  { %v655_v12 = vmul.f32 %v1499_v1, %v637_v55  ;;  %v656_v14 = vmul.f32 %v1499_v1, %v638_v56  ;;  %v657_v15 = vmul.f32 %v1499_v1, %v639_v59  ;;  %v658_v13 = vmul.f32 %v1499_v1, %v640_v61 }
 0x157   :  { %v688_v16 = vmul.f32 %v1504_v3, %v665_v4  ;;  %v675_v17 = vmul.f32 %v1504_v3, %v652_v7  ;;  %v676_v18 = vmul.f32 %v1504_v3, %v653_v8  ;;  %v677_v20 = vmul.f32 %v1504_v3, %v654_v9 }
 0x158   :  { %v678_v21 = vmul.f32 %v1504_v3, %v655_v12  ;;  %v679_v23 = vmul.f32 %v1504_v3, %v656_v14  ;;  %v680_v49 = vmul.f32 %v1504_v3, %v657_v15  ;;  %v659_v24 = vmul.f32 %v1499_v1, %v641_v60  ;;  %v766_v60 = vld [vmem:[%s1652_s4 + $0x20] sm:$0xff] }
 0x159   :  { %v1528_v26 = vadd.f32 %v1513_v10, %v688_v16  ;;  %v698_v27 = vadd.f32 %v1513_v10, %v675_v17  ;;  %v699_v54 = vadd.f32 %v1513_v10, %v676_v18  ;;  %v700_v29 = vadd.f32 %v1513_v10, %v677_v20 }
 0x15a   :  { %v701_v32 = vadd.f32 %v1513_v10, %v678_v21  ;;  %v702_v35 = vadd.f32 %v1513_v10, %v679_v23  ;;  %v703_v36 = vadd.f32 %v1513_v10, %v680_v49  ;;  %v681_v38 = vmul.f32 %v1504_v3, %v658_v13  ;;  %v769_v23 = vld [vmem:[%s1652_s4 + $0x38] sm:$0xff] }
 0x15b   :  { %vm714_vm2 = vcmp.ge.f32.partialorder %v698_v27, 0.0  ;;  %vm715_vm3 = vcmp.ge.f32.partialorder %v699_v54, 0.0  ;;  %v730_v39 = vmul.f32 0.2, %v698_v27  ;;  %v731_v41 = vmul.f32 0.2, %v699_v54 }
 0x15c   :  { %vm716_vm4 = vcmp.ge.f32.partialorder %v700_v29, 0.0  ;;  %vm717_vm5 = vcmp.ge.f32.partialorder %v701_v32, 0.0  ;;  %v732_v43 = vmul.f32 0.2, %v700_v29  ;;  %v733_v47 = vmul.f32 0.2, %v701_v32 }
 0x15d   :  { %v746_v48 = vsel %vm714_vm2, %v698_v27, %v730_v39  ;;  %v747_v50 = vsel %vm715_vm3, %v699_v54, %v731_v41  ;;  %vm718_vm6 = vcmp.ge.f32.partialorder %v702_v35, 0.0  ;;  %vm719_vm7 = vcmp.ge.f32.partialorder %v703_v36, 0.0 }
 0x15e   :  { %v778_v51 = vmul.f32 %v762_v28, %v746_v48  ;;  %v779_v44 = vmul.f32 %v763_v30, %v747_v50  ;;  %v748_v52 = vsel %vm716_vm4, %v700_v29, %v732_v43  ;;  %v749_v55 = vsel %vm717_vm5, %v701_v32, %v733_v47  ;;  %v770_v32 = vld [vmem:[%s1652_s4 + $0x40] sm:$0xff] }
 0x15f   :  { %v780_v56 = vmul.f32 %v764_v33, %v748_v52  ;;  %v781_v57 = vmul.f32 %v765_v34, %v749_v55  ;;  %v734_v59 = vmul.f32 0.2, %v702_v35  ;;  %v735_v61 = vmul.f32 0.2, %v703_v36  ;;  %v771_v34 = vld [vmem:[%s1652_s4 + $0x48] sm:$0xff] }
 0x160   :  { %v1080_v53 = vpack.c.bf16 %v779_v44, %v778_v51  ;;  %v682_v4 = vmul.f32 %v1504_v3, %v659_v24  ;;  %v704_v7 = vadd.f32 %v1513_v10, %v681_v38  ;;  %v660_v8 = vmul.f32 %v1499_v1, %v642_v5  ;;  %v768_v5 = vld [vmem:[%s1652_s4 + $0x30] sm:$0xff]  ;;  %v773_v44 = vld [vmem:[%s1652_s4 + $0x58] sm:$0xff] }
 0x161   :  { %v1083_v9 = vpack.c.bf16 %v781_v57, %v780_v56  ;;  %v750_v12 = vsel %vm718_vm6, %v702_v35, %v734_v59  ;;  %v751_v14 = vsel %vm719_vm7, %v703_v36, %v735_v61  ;;  %v661_v15 = vmul.f32 %v1499_v1, %v643_v2  ;;  %v772_v51 = vld [vmem:[%s1652_s4 + $0x50] sm:$0xff]  ;;  %v775_v56 = vld [vmem:[%s1652_s4 + $0x68] sm:$0xff] }
 0x162   :  { %1081 = vmatpush3.bf16.msra.mxu1 %v1080_v53  ;;  %v782_v13 = vmul.f32 %v766_v60, %v750_v12  ;;  %v783_v16 = vmul.f32 %v767_v62, %v751_v14  ;;  %v705_v17 = vadd.f32 %v1513_v10, %v682_v4  ;;  %vm720_vm8 = vcmp.ge.f32.partialorder %v704_v7, 0.0 }
 0x163   :  { %1082 = vmatprep.subr.bf16.mxu1 %v1178_v42  ;;  %v736_v22 = vmul.f32 0.2, %v704_v7  ;;  %v683_v18 = vmul.f32 %v1504_v3, %v660_v8  ;;  %v684_v20 = vmul.f32 %v1504_v3, %v661_v15  ;;  %v662_v25 = vmul.f32 %v1499_v1, %v644_v6  ;;  %v776_v15 = vld [vmem:[%s1652_s4 + $0x70] sm:$0xff] }
 0x164   :  { %v1086_v2 = vpack.c.bf16 %v783_v16, %v782_v13  ;;  %vm721_vm9 = vcmp.ge.f32.partialorder %v705_v17, 0.0  ;;  %v737_v21 = vmul.f32 0.2, %v705_v17  ;;  %v663_v49 = vmul.f32 %v1499_v1, %v645_v31 }
 0x165   :  { %v752_v24 = vsel %vm720_vm8, %v704_v7, %v736_v22  ;;  %v706_v27 = vadd.f32 %v1513_v10, %v683_v18  ;;  %v707_v54 = vadd.f32 %v1513_v10, %v684_v20  ;;  %v685_v40 = vmul.f32 %v1504_v3, %v662_v25  ;;  %v774_v7 = vld [vmem:[%s1652_s4 + $0x60] sm:$0xff] }
 0x166   :  { %1084 = vmatpush3.bf16.msra.mxu1 %v1083_v9  ;;  %v753_v6 = vsel %vm721_vm9, %v705_v17, %v737_v21  ;;  %v784_v28 = vmul.f32 %v768_v5, %v752_v24  ;;  %v686_v29 = vmul.f32 %v1504_v3, %v663_v49  ;;  %v664_v30 = vmul.f32 %v1499_v1, %v646_v37  ;;  %v794_v18 = vld [vmem:[%s1653_s5] sm:$0x3] }
 0x167   :  { %1085 = vmatprep.subr.bf16.mxu1 %v1178_v42  ;;  %v785_v46 = vmul.f32 %v769_v23, %v753_v6  ;;  %vm722_vm10 = vcmp.ge.f32.partialorder %v706_v27, 0.0  ;;  %vm723_vm11 = vcmp.ge.f32.partialorder %v707_v54, 0.0  ;;  %v738_v31 = vmul.f32 0.2, %v706_v27 }
 0x168   :  { %v739_v33 = vmul.f32 0.2, %v707_v54  ;;  %v708_v35 = vadd.f32 %v1513_v10, %v685_v40  ;;  %v709_v0 = vadd.f32 %v1513_v10, %v686_v29  ;;  %v687_v37 = vmul.f32 %v1504_v3, %v664_v30 }
 0x169   :  { %v1089_v36 = vpack.c.bf16 %v785_v46, %v784_v28  ;;  %v754_v38 = vsel %vm722_vm10, %v706_v27, %v738_v31  ;;  %vm727_vm12 = vcmp.ge.f32.partialorder %v1528_v26, 0.0  ;;  %v743_v39 = vmul.f32 0.2, %v1528_v26 }
 0x16a   :  { %1087 = vmatpush3.bf16.msra.mxu1 %v1086_v2  ;;  %v755_v41 = vsel %vm723_vm11, %v707_v54, %v739_v33  ;;  %v786_v43 = vmul.f32 %v770_v32, %v754_v38  ;;  %vm724_vm13 = vcmp.ge.f32.partialorder %v708_v35, 0.0  ;;  %vm725_vm14 = vcmp.ge.f32.partialorder %v709_v0, 0.0 }
 0x16b   :  { %1088 = vmatprep.subr.bf16.mxu1 %v1178_v42  ;;  %v787_v47 = vmul.f32 %v771_v34, %v755_v41  ;;  %v740_v48 = vmul.f32 0.2, %v708_v35  ;;  %v741_v50 = vmul.f32 0.2, %v709_v0  ;;  %v710_v52 = vadd.f32 %v1513_v10, %v687_v37 }
 0x16c   :  { %v759_v55 = vsel %vm727_vm12, %v1528_v26, %v743_v39  ;;  %v666_v57 = vmul.f32 %v1499_v1, %v648_v58  ;;  %v667_v59 = vmul.f32 %v1499_v1, %v649_v63  ;;  %vm865_vm2 = vcmask 254976  }
 0x16d   :  { %v1092_v61 = vpack.c.bf16 %v787_v47, %v786_v43  ;;  %v756_v60 = vsel %vm724_vm13, %v708_v35, %v740_v48  ;;  %v757_v62 = vsel %vm725_vm14, %v709_v0, %v741_v50  ;;  %vm726_vm15 = vcmp.ge.f32.partialorder %v710_v52, 0.0 }
 0x16e   :  { %1090 = vmatpush3.bf16.msra.mxu1 %v1089_v36  ;;  %v788_v26 = vmul.f32 %v772_v51, %v756_v60  ;;  %v789_v53 = vmul.f32 %v773_v44, %v757_v62  ;;  %v742_v4 = vmul.f32 0.2, %v710_v52  ;;  %v791_v11 = vmul.f32 %v775_v56, %v759_v55 }
 0x16f   :  { %1091 = vmatprep.subr.bf16.mxu1 %v1178_v42  ;;  %v689_v58 = vmul.f32 %v1504_v3, %v666_v57  ;;  %v690_v19 = vmul.f32 %v1504_v3, %v667_v59  ;;  %v777_v3 = vld [vmem:[%s1652_s4 + $0x78] sm:$0xff]  ;;  %vm875_vm3 = vcmask 1024  }
 0x170   :  { %v1095_v45 = vpack.c.bf16 %v789_v53, %v788_v26  ;;  %v758_v63 = vsel %vm726_vm15, %v710_v52, %v742_v4 }
 0x171   :  { %v790_v1 = vmul.f32 %v774_v7, %v758_v63  ;;  %v712_v8 = vadd.f32 %v1513_v10, %v689_v58  ;;  %v713_v9 = vadd.f32 %v1513_v10, %v690_v19 }
 0x172   :  { %1093 = vmatpush3.bf16.msra.mxu1 %v1092_v61 }
 0x173   :  { %1094 = vmatprep.subr.bf16.mxu1 %v1178_v42  ;;  %v1098_v12 = vpack.c.bf16 %v791_v11, %v790_v1  ;;  %vm728_vm0 = vcmp.ge.f32.partialorder %v712_v8, 0.0  ;;  %vm729_vm1 = vcmp.ge.f32.partialorder %v713_v9, 0.0  ;;  %v744_v14 = vmul.f32 0.2, %v712_v8 }
 0x174   :  { %v745_v13 = vmul.f32 0.2, %v713_v9 }
 0x175   :  { %v760_v16 = vsel %vm728_vm0, %v712_v8, %v744_v14 }
 0x176   :  { %1096 = vmatpush3.bf16.msra.mxu1 %v1095_v45  ;;  %v761_v17 = vsel %vm729_vm1, %v713_v9, %v745_v13  ;;  %v792_v10 = vmul.f32 %v776_v15, %v760_v16 }
 0x177   :  { %1097 = vmatprep.subr.bf16.mxu1 %v1178_v42  ;;  %v793_v22 = vmul.f32 %v777_v3, %v761_v17 }
 0x179   :  { %v1101_v5 = vpack.c.bf16 %v793_v22, %v792_v10 }
 0x17a   :  { %1099 = vmatpush3.bf16.msra.mxu1 %v1098_v12 }
 0x17b   :  { %1100 = vmatprep.subr.bf16.mxu1 %v1178_v42 }
 0x17e   :  { %1102 = vmatpush3.bf16.msra.mxu1 %v1101_v5 }
 0x181   :  { %1077 = vmatmul.mubr.f32.vlgmr.msra.gmra.mrb[20].mxu1 %v794_v18 }
 0x254   :  { %v861_v20 = vpop.f32.mrb[20].mxu1 }
 0x255   :  { %v1078_v25 = vpop.f32.mrb[21].mxu1  ;;  %v866_v2 = vsel %vm865_vm2, %v861_v20, 0.0 }
 0x256   :  { %867 = vadd.xlane.f32.xlu0 %v866_v2 }
 0x2e3   :  { %v868_v21 = vpop.xlane.xlu0 %867 }
 0x2e4   :  { %v869_v23 = vsub.f32 0.0, %v868_v21 }
 0x2e6   :  { %v870_v49 = vmul.f32 1.442695, %v869_v23 }
 0x2e8   :  { %1174 = vpow2.f32 %v870_v49 }
 0x2f2   :  { %v1175_v24 = vpop.eup %1174 }
 0x2f3   :  { %v872_v27 = vadd.f32 1.0, %v1175_v24 }
 0x2f5   :  { %1176 = vrcp.f32 %v872_v27 }
 0x2ff   :  { %v1177_v42 = vpop.eup %1176 }
 0x300   :  { %876 = vst.msk [vmem:[%s1654_s6] sm:$0x3] %vm875_vm3, %v1177_v42 }

</bundles_post_ra>
